<compile_context>
chip_gen: v6e
topology: v6e:2x2x1
jax: 0.10.0
libtpu: 0.0.40
codegen_flags: <defaults>
</compile_context>

<pallas_src>
import functools

import jax
import jax.numpy as jnp
from jax import lax
from jax.experimental import pallas as pl
from jax.experimental.pallas import tpu as pltpu


def _round_up(v, m):
    return ((v + m - 1) // m) * m


def _wavenet_block_kernel(*refs, conv_len, dilation, t_tile, tiles_per_split,
                          pad, pad128, c_in, c_out, c_skip,
                          has_halo, has_eq, compute_dtype):
    """One (time-split, batch, time-tile) slab per grid step.

    refs (in order):
      x_ref     : (1, C_in, T_TILE)        current time tile (I/O dtype)
      halo_ref  : (1, 1, C_in, PAD128)     causal-halo seed      [if has_halo]
      w_taps    : (K, C_out, C_in)         dilated conv taps (compute dtype)
      w_eq      : (C_in, C_out)            1x1 equalize conv     [if has_eq]
      w_skip    : (C_skip, C_in)           1x1 skip conv
      misc      : (C_max, 4) f32           col0=b_dil col1=b_eq col2=b_skip col3=scale
      res_ref   : (1, C_in, T_TILE)
      skip_ref  : (1, C_skip, T_TILE)
      xext_ref  : (C_in, PAD128 + T_TILE)  persistent scratch [halo | tile] (compute dtype)
    """
    it = iter(refs)
    x_ref = next(it)
    halo_ref = next(it) if has_halo else None
    w_taps_ref = next(it)
    w_eq_ref = next(it) if has_eq else None
    w_skip_ref = next(it)
    misc_ref = next(it)
    res_ref = next(it)
    skip_ref = next(it)
    xext_ref = next(it)

    tt = pl.program_id(2)

    # Seed the causal halo at the first time-tile of every (split, batch).
    if has_halo:
        @pl.when(tt == 0)
        def _seed_halo():
            xext_ref[:, :pad128] = halo_ref[0, 0]

    # Lane-aligned (pad128 % 128 == 0) store of the current tile into the
    # extended buffer, cast once to the MXU compute dtype.
    xext_ref[:, pad128:] = x_ref[0].astype(compute_dtype)

    # Dilated causal conv: K thin matmuls straight off the shifted views
    # (no staging buffer; the MXU has plenty of slack at these channel counts).
    base = pad128 - pad
    acc = jnp.zeros((c_out, t_tile), jnp.float32)
    for k in range(conv_len):
        off = base + k * dilation
        view = xext_ref[:, off:off + t_tile]              # (C_in, T_TILE)
        acc = acc + jnp.dot(w_taps_ref[k], view,
                            preferred_element_type=jnp.float32)

    # + b_dil, then ClampedSineAct(w0=1, thr=None).  Kept in f32 (v5e has no
    # bf16 VPU/EUP path; on v6e/v7x the activation is not the binding unit).
    h32 = jnp.sin(acc + misc_ref[:c_out, 0:1])

    if has_eq:
        h_c = h32.astype(compute_dtype)
        out32 = (jnp.dot(w_eq_ref[...], h_c, preferred_element_type=jnp.float32)
                 + misc_ref[:c_in, 1:2])                  # + b_eq
        out_c = out32.astype(compute_dtype)
    else:
        out32 = h32                                       # nn.Identity()
        out_c = h32.astype(compute_dtype)

    # Dropout1d(p=0) is the identity in the forward pass.
    scale = misc_ref[:c_in, 3:4]
    res_ref[0] = ((out32 + x_ref[0].astype(jnp.float32)) * scale
                  ).astype(res_ref.dtype)

    sk = (jnp.dot(w_skip_ref[...], out_c, preferred_element_type=jnp.float32)
          + misc_ref[:c_skip, 2:3])                       # + b_skip
    skip_ref[0] = sk.astype(skip_ref.dtype)

    # Carry the causal halo: the next tile needs the last `pad` samples of this
    # one.  Both src and dst start on 128-lane boundaries -> unmasked copy.
    if has_halo and tiles_per_split > 1:
        xext_ref[:, :pad128] = xext_ref[:, t_tile:]


def _pick_t_tile(t_extent, pad128, target):
    """Largest multiple-of-128 divisor of t_extent that is <= target and covers
    the (128-rounded) causal halo; falls back to the smallest valid divisor."""
    if t_extent % 128 != 0:
        return None
    cands = [c for c in range(128, t_extent + 1, 128)
             if t_extent % c == 0 and c >= max(pad128, 128)]
    if not cands:
        return None
    le = [c for c in cands if c <= target]
    return max(le) if le else min(cands)


def casual_wavenet_block(x, params, *, conv_len, dilation, t_tile=None,
                         compute_dtype=jnp.bfloat16, time_splits=None,
                         t_tile_target=8192, interpret=False):
    """x: (B, C_in, T).  Returns (res (B, C_in, T), skip (B, C_skip, T))."""
    B, C_in, T = x.shape
    io_dtype = x.dtype
    compute_dtype = jnp.dtype(compute_dtype)

    pad = dilation * (conv_len - 1)
    has_halo = pad > 0
    pad128 = _round_up(pad, 128) if has_halo else 0

    w_dil = params["w_dil"]                       # (C_out, C_in, K)
    C_out = w_dil.shape[0]
    C_skip = params["w_skip"].shape[0]
    has_eq = C_in != C_out                        # nn.Identity when equal (static skip)

    # ---- time tiling / optional 2-way time split (v7x megacore when B == 1) ----
    if time_splits is None:
        time_splits = 2 if B == 1 else 1
    if time_splits > 1 and (T % time_splits != 0
                            or _pick_t_tile(T // time_splits, pad128, t_tile_target) is None):
        time_splits = 1
    T_split = T // time_splits

    if t_tile is None:
        t_tile = _pick_t_tile(T_split, pad128, t_tile_target)
        if t_tile is None:                        # T not a multiple of 128: one full block
            time_splits, T_split, t_tile = 1, T, T
    assert T_split % t_tile == 0, "time tile must divide the per-split length"
    tiles_per_split = T_split // t_tile
    if tiles_per_split > 1:
        assert t_tile % 128 == 0 and t_tile >= pad, \
            "multi-tile runs need a 128-aligned time tile covering the causal halo"

    # ---- parameter packing (MXU operands in the compute dtype) ----
    w_taps = jnp.transpose(w_dil, (2, 0, 1)).astype(compute_dtype)   # (K, C_out, C_in)
    w_skip = params["w_skip"].astype(compute_dtype)
    w_eq = params["w_eq"].astype(compute_dtype) if has_eq else None

    # Small per-channel vectors packed into one resident f32 block:
    #   col0 = b_dil, col1 = b_eq, col2 = b_skip, col3 = scale.
    C_max = max(C_in, C_out, C_skip)
    misc = jnp.zeros((C_max, 4), jnp.float32)
    misc = misc.at[:C_out, 0].set(params["b_dil"].astype(jnp.float32))
    if has_eq:
        misc = misc.at[:C_in, 1].set(params["b_eq"].astype(jnp.float32))
    misc = misc.at[:C_skip, 2].set(params["b_skip"].astype(jnp.float32))
    misc = misc.at[:C_in, 3].set(params["scale"].astype(jnp.float32))

    # ---- operands / BlockSpecs ----
    operands = [x]
    in_specs = [pl.BlockSpec((1, C_in, t_tile),
                             lambda s, b, t: (b, 0, s * tiles_per_split + t))]
    if has_halo:
        # Causal-halo seed for the first tile of every (split, batch): zeros for
        # split 0, the preceding `pad` samples of x for later splits.
        halo = jnp.zeros((time_splits, B, C_in, pad128), compute_dtype)
        if time_splits > 1:
            seeds = jnp.stack([x[:, :, s * T_split - pad: s * T_split]
                               for s in range(1, time_splits)], axis=0)
            halo = halo.at[1:, :, :, pad128 - pad:].set(seeds.astype(compute_dtype))
        operands.append(halo)
        in_specs.append(pl.BlockSpec((1, 1, C_in, pad128),
                                     lambda s, b, t: (s, b, 0, 0)))
    operands.append(w_taps)
    in_specs.append(pl.BlockSpec((conv_len, C_out, C_in), lambda s, b, t: (0, 0, 0)))
    if has_eq:
        operands.append(w_eq)
        in_specs.append(pl.BlockSpec((C_in, C_out), lambda s, b, t: (0, 0)))
    operands.append(w_skip)
    in_specs.append(pl.BlockSpec((C_skip, C_in), lambda s, b, t: (0, 0)))
    operands.append(misc)
    in_specs.append(pl.BlockSpec((C_max, 4), lambda s, b, t: (0, 0)))

    kernel = functools.partial(
        _wavenet_block_kernel, conv_len=conv_len, dilation=dilation,
        t_tile=t_tile, tiles_per_split=tiles_per_split, pad=pad, pad128=pad128,
        c_in=C_in, c_out=C_out, c_skip=C_skip,
        has_halo=has_halo, has_eq=has_eq, compute_dtype=compute_dtype)

    # Advisory cost estimate (kernel is HBM-bandwidth bound at these widths).
    flops = 2 * B * T * (conv_len * C_out * C_in + C_skip * C_in
                         + (C_in * C_out if has_eq else 0))
    bytes_accessed = ((2 * C_in + C_skip) * B * T * io_dtype.itemsize
                      + sum(int(o.size) * o.dtype.itemsize for o in operands[1:]))
    cost = pl.CostEstimate(flops=int(flops), transcendentals=int(B * T * C_out),
                           bytes_accessed=int(bytes_accessed))

    # Scoped-VMEM budget from the per-step footprint, capped at 3/4 of physical.
    bpe_io = io_dtype.itemsize
    bpe_c = compute_dtype.itemsize
    blk_bytes = (2 * C_in + C_skip) * t_tile * bpe_io           # x + res + skip blocks
    halo_bytes = C_in * pad128 * bpe_c if has_halo else 0
    scratch_bytes = C_in * (pad128 + t_tile) * bpe_c            # xext
    interm_bytes = (3 * C_out + 2 * C_in + C_skip) * t_tile * 4  # f32 temporaries
    weight_bytes = (int(w_taps.size) + int(w_skip.size)
                    + (int(w_eq.size) if has_eq else 0)) * bpe_c + int(misc.size) * 4
    step_bytes = (2 * (blk_bytes + halo_bytes) + scratch_bytes + interm_bytes
                  + 2 * weight_bytes + (1 << 20))
    try:
        vmem_cap = int(pltpu.get_tpu_info().vmem_capacity_bytes)  # 64 MiB v7x, 128 MiB v5e/v6e
    except Exception:
        vmem_cap = 64 << 20
    vmem_limit = int(min(max(2 * step_bytes, 32 << 20), vmem_cap * 3 // 4))

    res, skip = pl.pallas_call(
        kernel,
        out_shape=(jax.ShapeDtypeStruct((B, C_in, T), io_dtype),
                   jax.ShapeDtypeStruct((B, C_skip, T), io_dtype)),
        grid=(time_splits, B, tiles_per_split),
        in_specs=in_specs,
        out_specs=(
            pl.BlockSpec((1, C_in, t_tile),
                         lambda s, b, t: (b, 0, s * tiles_per_split + t)),
            pl.BlockSpec((1, C_skip, t_tile),
                         lambda s, b, t: (b, 0, s * tiles_per_split + t)),
        ),
        scratch_shapes=[pltpu.VMEM((C_in, pad128 + t_tile), compute_dtype)],
        compiler_params=pltpu.CompilerParams(
            dimension_semantics=("parallel", "parallel", "arbitrary"),
            vmem_limit_bytes=vmem_limit),
        cost_estimate=cost,
        interpret=interpret,
    )(*operands)
    return res, skip


def _reference(x, params, *, conv_len, dilation):
    """Pure-JAX reference mirroring the PyTorch forward."""
    pad = dilation * (conv_len - 1)
    conv = lax.conv_general_dilated(
        x, params["w_dil"], window_strides=(1,), padding=[(pad, 0)],
        rhs_dilation=(dilation,), dimension_numbers=("NCH", "OIH", "NCH"))
    h = jnp.sin(conv + params["b_dil"][None, :, None])
    C_in, C_out = x.shape[1], params["w_dil"].shape[0]
    if C_in != C_out:
        out = (jnp.einsum("oc,bct->bot", params["w_eq"], h)
               + params["b_eq"][None, :, None])
    else:
        out = h
    res = (out + x) * params["scale"][None, :, None]
    skip = (jnp.einsum("sc,bct->bst", params["w_skip"], out)
            + params["b_skip"][None, :, None])
    return res, skip


def init_params(key, in_channels, out_channels, skip_channels, conv_len):
    """Deterministic synthetic parameters matching the PyTorch module's shapes."""
    ks = jax.random.split(key, 6)
    p = {
        "w_dil": 0.15 * jax.random.normal(
            ks[0], (out_channels, in_channels, conv_len), jnp.float32),
        "b_dil": 0.1 * jax.random.normal(ks[1], (out_channels,), jnp.float32),
        "w_skip": 0.15 * jax.random.normal(
            ks[2], (skip_channels, in_channels), jnp.float32),
        "b_skip": 0.1 * jax.random.normal(ks[3], (skip_channels,), jnp.float32),
        "scale": 0.5 * jnp.ones((in_channels,), jnp.float32),
    }
    if in_channels != out_channels:
        p["w_eq"] = 0.15 * jax.random.normal(
            ks[4], (in_channels, out_channels), jnp.float32)
        p["b_eq"] = 0.1 * jax.random.normal(ks[5], (in_channels,), jnp.float32)
    return p


def _check(name, got, ref, tol):
    r, s = got
    rr, sr = ref
    assert r.shape == rr.shape and s.shape == sr.shape
    r_err = float(jnp.max(jnp.abs(r.astype(jnp.float32) - rr)))
    s_err = float(jnp.max(jnp.abs(s.astype(jnp.float32) - sr)))
    assert r_err < tol and s_err < tol, (name, r_err, s_err)


if __name__ == "__main__":
    key = jax.random.PRNGKey(0)

    # Config 1: C_in != C_out (equalize_channels active), 2 time tiles so the
    # causal-halo carry is exercised; f32 compute path for tighter validation.
    B, C_IN, C_OUT, C_SKIP = 2, 8, 16, 8
    T, CONV_LEN, DILATION = 512, 7, 2
    k_x, k_p, key = jax.random.split(key, 3)
    x1 = jax.random.normal(k_x, (B, C_IN, T), jnp.float32)
    p1 = init_params(k_p, C_IN, C_OUT, C_SKIP, CONV_LEN)
    out1 = casual_wavenet_block(x1, p1, conv_len=CONV_LEN, dilation=DILATION,
                                t_tile=256, compute_dtype=jnp.float32)
    jax.block_until_ready(out1)
    _check("cfg1", out1, _reference(x1, p1, conv_len=CONV_LEN, dilation=DILATION),
           tol=2e-2)

    # Config 2: C_in == C_out (equalize_channels == nn.Identity, statically
    # skipped), auto-picked single large time tile, bf16 MXU path.
    B2, C2, C_SKIP2 = 2, 8, 4
    T2, CONV_LEN2, DILATION2 = 1024, 5, 4
    k_x2, k_p2, key = jax.random.split(key, 3)
    x2 = jax.random.normal(k_x2, (B2, C2, T2), jnp.float32)
    p2 = init_params(k_p2, C2, C2, C_SKIP2, CONV_LEN2)
    out2 = casual_wavenet_block(x2, p2, conv_len=CONV_LEN2, dilation=DILATION2)
    jax.block_until_ready(out2)
    _check("cfg2", out2, _reference(x2, p2, conv_len=CONV_LEN2, dilation=DILATION2),
           tol=5e-2)

    # Config 3: B == 1 -> automatic 2-way time split (v7x megacore occupancy),
    # with per-split halo seeds read from x and halo carry within each split.
    B3, C3, C_SKIP3 = 1, 16, 16
    T3, CONV_LEN3, DILATION3 = 2048, 7, 4
    k_x3, k_p3, key = jax.random.split(key, 3)
    x3 = jax.random.normal(k_x3, (B3, C3, T3), jnp.float32)
    p3 = init_params(k_p3, C3, C3, C_SKIP3, CONV_LEN3)
    out3 = casual_wavenet_block(x3, p3, conv_len=CONV_LEN3, dilation=DILATION3,
                                t_tile=512)
    jax.block_until_ready(out3)
    _check("cfg3", out3, _reference(x3, p3, conv_len=CONV_LEN3, dilation=DILATION3),
           tol=5e-2)

    # TODO(synk): training-mode Dropout1d (p > 0) is not implemented; the module's
    # default p=0 / eval forward is the identity, which is what this kernel computes.
    print("KERNEL_OK")
</pallas_src>

<mosaic_0001>
module attributes {stable_mosaic.version = 11 : i64} {
  func.func @_wavenet_block_kernel(%arg0: i32, %arg1: i32, %arg2: i32, %arg3: memref<1x8x256xf32, #tpu.memory_space<vmem>>, %arg4: memref<1x1x8x128xf32, #tpu.memory_space<vmem>>, %arg5: memref<7x16x8xf32, #tpu.memory_space<vmem>>, %arg6: memref<8x16xf32, #tpu.memory_space<vmem>>, %arg7: memref<8x8xf32, #tpu.memory_space<vmem>>, %arg8: memref<16x4xf32, #tpu.memory_space<vmem>>, %arg9: memref<1x8x256xf32, #tpu.memory_space<vmem>>, %arg10: memref<1x8x256xf32, #tpu.memory_space<vmem>>, %arg11: memref<8x384xf32, #tpu.memory_space<vmem>>) attributes {dimension_semantics = [#tpu.dimension_semantics<parallel>, #tpu.dimension_semantics<parallel>, #tpu.dimension_semantics<arbitrary>], iteration_bounds = array<i64: 1, 2, 2>, scalar_prefetch = 0 : i64, scratch_operands = 1 : i64, tpu.core_type = #tpu.core_type<tc>, window_params = [{transform_indices = @transform_0, window_bounds = array<i64: 1, 8, 256>}, {transform_indices = @transform_1, window_bounds = array<i64: 1, 1, 8, 128>}, {pipeline_mode = #tpu.pipeline_mode<synchronous>, transform_indices = @transform_2, window_bounds = array<i64: 7, 16, 8>}, {pipeline_mode = #tpu.pipeline_mode<synchronous>, transform_indices = @transform_3, window_bounds = array<i64: 8, 16>}, {pipeline_mode = #tpu.pipeline_mode<synchronous>, transform_indices = @transform_4, window_bounds = array<i64: 8, 8>}, {pipeline_mode = #tpu.pipeline_mode<synchronous>, transform_indices = @transform_5, window_bounds = array<i64: 16, 4>}, {transform_indices = @transform_6, window_bounds = array<i64: 1, 8, 256>}, {transform_indices = @transform_7, window_bounds = array<i64: 1, 8, 256>}]} {
    %c0_i32 = arith.constant 0 : i32
    %0 = arith.cmpi eq, %arg2, %c0_i32 : i32
    %1 = arith.extui %0 : i1 to i32
    %c0_i32_0 = arith.constant 0 : i32
    %2 = arith.cmpi ne, %1, %c0_i32_0 : i32
    scf.if %2 {
      %c0_60 = arith.constant 0 : index
      %c0_61 = arith.constant 0 : index
      %c0_62 = arith.constant 0 : index
      %c0_63 = arith.constant 0 : index
      %70 = vector.load %arg4[%c0_60, %c0_61, %c0_62, %c0_63] : memref<1x1x8x128xf32, #tpu.memory_space<vmem>>, vector<1x1x8x128xf32>
      %71 = vector.shape_cast %70 : vector<1x1x8x128xf32> to vector<8x128xf32>
      %c0_64 = arith.constant 0 : index
      %c0_65 = arith.constant 0 : index
      %72 = vector.load %arg11[%c0_64, %c0_65] : memref<8x384xf32, #tpu.memory_space<vmem>>, vector<8x128xf32>
      tpu.vector_store %arg11[%c0_64, %c0_65], %71 {strides = array<i32>} : memref<8x384xf32, #tpu.memory_space<vmem>>, vector<8x128xf32>,
    } else {
    }
    %c0 = arith.constant 0 : index
    %c0_1 = arith.constant 0 : index
    %c0_2 = arith.constant 0 : index
    %3 = vector.load %arg3[%c0, %c0_1, %c0_2] : memref<1x8x256xf32, #tpu.memory_space<vmem>>, vector<1x8x256xf32>
    %4 = vector.shape_cast %3 : vector<1x8x256xf32> to vector<8x256xf32>
    %c0_3 = arith.constant 0 : index
    %c128 = arith.constant 128 : index
    %5 = vector.load %arg11[%c0_3, %c128] : memref<8x384xf32, #tpu.memory_space<vmem>>, vector<8x256xf32>
    tpu.vector_store %arg11[%c0_3, %c128], %4 {strides = array<i32>} : memref<8x384xf32, #tpu.memory_space<vmem>>, vector<8x256xf32>,
    %cst = arith.constant 0.000000e+00 : f32
    %6 = vector.broadcast %cst : f32 to vector<16x256xf32>
    %c0_4 = arith.constant 0 : index
    %c116 = arith.constant 116 : index
    %7 = vector.load %arg11[%c0_4, %c116] : memref<8x384xf32, #tpu.memory_space<vmem>>, vector<8x256xf32>
    %c0_5 = arith.constant 0 : index
    %c0_6 = arith.constant 0 : index
    %c0_7 = arith.constant 0 : index
    %8 = vector.load %arg5[%c0_5, %c0_6, %c0_7] : memref<7x16x8xf32, #tpu.memory_space<vmem>>, vector<1x16x8xf32>
    %9 = vector.shape_cast %8 : vector<1x16x8xf32> to vector<16x8xf32>
    %cst_8 = arith.constant dense<0.000000e+00> : vector<16x256xf32>
    %10 = tpu.matmul %9, %7, %cst_8 {dimension_numbers = #tpu.dot_dimension_numbers<[1], [0], [0], [1], [0, 0, 1, 1], [], []>} : vector<16x8xf32>, vector<8x256xf32>, vector<16x256xf32> -> vector<16x256xf32>
    %11 = arith.addf %6, %10 : vector<16x256xf32>
    %c0_9 = arith.constant 0 : index
    %c118 = arith.constant 118 : index
    %12 = vector.load %arg11[%c0_9, %c118] : memref<8x384xf32, #tpu.memory_space<vmem>>, vector<8x256xf32>
    %c1 = arith.constant 1 : index
    %c0_10 = arith.constant 0 : index
    %c0_11 = arith.constant 0 : index
    %13 = vector.load %arg5[%c1, %c0_10, %c0_11] : memref<7x16x8xf32, #tpu.memory_space<vmem>>, vector<1x16x8xf32>
    %14 = vector.shape_cast %13 : vector<1x16x8xf32> to vector<16x8xf32>
    %cst_12 = arith.constant dense<0.000000e+00> : vector<16x256xf32>
    %15 = tpu.matmul %14, %12, %cst_12 {dimension_numbers = #tpu.dot_dimension_numbers<[1], [0], [0], [1], [0, 0, 1, 1], [], []>} : vector<16x8xf32>, vector<8x256xf32>, vector<16x256xf32> -> vector<16x256xf32>
    %16 = arith.addf %11, %15 : vector<16x256xf32>
    %c0_13 = arith.constant 0 : index
    %c120 = arith.constant 120 : index
    %17 = vector.load %arg11[%c0_13, %c120] : memref<8x384xf32, #tpu.memory_space<vmem>>, vector<8x256xf32>
    %c2 = arith.constant 2 : index
    %c0_14 = arith.constant 0 : index
    %c0_15 = arith.constant 0 : index
    %18 = vector.load %arg5[%c2, %c0_14, %c0_15] : memref<7x16x8xf32, #tpu.memory_space<vmem>>, vector<1x16x8xf32>
    %19 = vector.shape_cast %18 : vector<1x16x8xf32> to vector<16x8xf32>
    %cst_16 = arith.constant dense<0.000000e+00> : vector<16x256xf32>
    %20 = tpu.matmul %19, %17, %cst_16 {dimension_numbers = #tpu.dot_dimension_numbers<[1], [0], [0], [1], [0, 0, 1, 1], [], []>} : vector<16x8xf32>, vector<8x256xf32>, vector<16x256xf32> -> vector<16x256xf32>
    %21 = arith.addf %16, %20 : vector<16x256xf32>
    %c0_17 = arith.constant 0 : index
    %c122 = arith.constant 122 : index
    %22 = vector.load %arg11[%c0_17, %c122] : memref<8x384xf32, #tpu.memory_space<vmem>>, vector<8x256xf32>
    %c3 = arith.constant 3 : index
    %c0_18 = arith.constant 0 : index
    %c0_19 = arith.constant 0 : index
    %23 = vector.load %arg5[%c3, %c0_18, %c0_19] : memref<7x16x8xf32, #tpu.memory_space<vmem>>, vector<1x16x8xf32>
    %24 = vector.shape_cast %23 : vector<1x16x8xf32> to vector<16x8xf32>
    %cst_20 = arith.constant dense<0.000000e+00> : vector<16x256xf32>
    %25 = tpu.matmul %24, %22, %cst_20 {dimension_numbers = #tpu.dot_dimension_numbers<[1], [0], [0], [1], [0, 0, 1, 1], [], []>} : vector<16x8xf32>, vector<8x256xf32>, vector<16x256xf32> -> vector<16x256xf32>
    %26 = arith.addf %21, %25 : vector<16x256xf32>
    %c0_21 = arith.constant 0 : index
    %c124 = arith.constant 124 : index
    %27 = vector.load %arg11[%c0_21, %c124] : memref<8x384xf32, #tpu.memory_space<vmem>>, vector<8x256xf32>
    %c4 = arith.constant 4 : index
    %c0_22 = arith.constant 0 : index
    %c0_23 = arith.constant 0 : index
    %28 = vector.load %arg5[%c4, %c0_22, %c0_23] : memref<7x16x8xf32, #tpu.memory_space<vmem>>, vector<1x16x8xf32>
    %29 = vector.shape_cast %28 : vector<1x16x8xf32> to vector<16x8xf32>
    %cst_24 = arith.constant dense<0.000000e+00> : vector<16x256xf32>
    %30 = tpu.matmul %29, %27, %cst_24 {dimension_numbers = #tpu.dot_dimension_numbers<[1], [0], [0], [1], [0, 0, 1, 1], [], []>} : vector<16x8xf32>, vector<8x256xf32>, vector<16x256xf32> -> vector<16x256xf32>
    %31 = arith.addf %26, %30 : vector<16x256xf32>
    %c0_25 = arith.constant 0 : index
    %c126 = arith.constant 126 : index
    %32 = vector.load %arg11[%c0_25, %c126] : memref<8x384xf32, #tpu.memory_space<vmem>>, vector<8x256xf32>
    %c5 = arith.constant 5 : index
    %c0_26 = arith.constant 0 : index
    %c0_27 = arith.constant 0 : index
    %33 = vector.load %arg5[%c5, %c0_26, %c0_27] : memref<7x16x8xf32, #tpu.memory_space<vmem>>, vector<1x16x8xf32>
    %34 = vector.shape_cast %33 : vector<1x16x8xf32> to vector<16x8xf32>
    %cst_28 = arith.constant dense<0.000000e+00> : vector<16x256xf32>
    %35 = tpu.matmul %34, %32, %cst_28 {dimension_numbers = #tpu.dot_dimension_numbers<[1], [0], [0], [1], [0, 0, 1, 1], [], []>} : vector<16x8xf32>, vector<8x256xf32>, vector<16x256xf32> -> vector<16x256xf32>
    %36 = arith.addf %31, %35 : vector<16x256xf32>
    %c0_29 = arith.constant 0 : index
    %c128_30 = arith.constant 128 : index
    %37 = vector.load %arg11[%c0_29, %c128_30] : memref<8x384xf32, #tpu.memory_space<vmem>>, vector<8x256xf32>
    %c6 = arith.constant 6 : index
    %c0_31 = arith.constant 0 : index
    %c0_32 = arith.constant 0 : index
    %38 = vector.load %arg5[%c6, %c0_31, %c0_32] : memref<7x16x8xf32, #tpu.memory_space<vmem>>, vector<1x16x8xf32>
    %39 = vector.shape_cast %38 : vector<1x16x8xf32> to vector<16x8xf32>
    %cst_33 = arith.constant dense<0.000000e+00> : vector<16x256xf32>
    %40 = tpu.matmul %39, %37, %cst_33 {dimension_numbers = #tpu.dot_dimension_numbers<[1], [0], [0], [1], [0, 0, 1, 1], [], []>} : vector<16x8xf32>, vector<8x256xf32>, vector<16x256xf32> -> vector<16x256xf32>
    %41 = arith.addf %36, %40 : vector<16x256xf32>
    %c0_34 = arith.constant 0 : index
    %c0_35 = arith.constant 0 : index
    %42 = vector.load %arg8[%c0_34, %c0_35] : memref<16x4xf32, #tpu.memory_space<vmem>>, vector<16x1xf32>
    %43 = vector.broadcast %42 : vector<16x1xf32> to vector<16x256xf32>
    %44 = arith.addf %41, %43 : vector<16x256xf32>
    %45 = math.sin %44 : vector<16x256xf32>
    %c0_36 = arith.constant 0 : index
    %c0_37 = arith.constant 0 : index
    %46 = vector.load %arg6[%c0_36, %c0_37] : memref<8x16xf32, #tpu.memory_space<vmem>>, vector<8x16xf32>
    %cst_38 = arith.constant dense<0.000000e+00> : vector<8x256xf32>
    %47 = tpu.matmul %46, %45, %cst_38 {dimension_numbers = #tpu.dot_dimension_numbers<[1], [0], [0], [1], [0, 0, 1, 1], [], []>} : vector<8x16xf32>, vector<16x256xf32>, vector<8x256xf32> -> vector<8x256xf32>
    %c0_39 = arith.constant 0 : index
    %c1_40 = arith.constant 1 : index
    %48 = vector.load %arg8[%c0_39, %c1_40] : memref<16x4xf32, #tpu.memory_space<vmem>>, vector<8x1xf32>
    %49 = vector.broadcast %48 : vector<8x1xf32> to vector<8x256xf32>
    %50 = arith.addf %47, %49 : vector<8x256xf32>
    %c0_41 = arith.constant 0 : index
    %c3_42 = arith.constant 3 : index
    %51 = vector.load %arg8[%c0_41, %c3_42] : memref<16x4xf32, #tpu.memory_space<vmem>>, vector<8x1xf32>
    %c0_43 = arith.constant 0 : index
    %c0_44 = arith.constant 0 : index
    %c0_45 = arith.constant 0 : index
    %52 = vector.load %arg3[%c0_43, %c0_44, %c0_45] : memref<1x8x256xf32, #tpu.memory_space<vmem>>, vector<1x8x256xf32>
    %53 = vector.shape_cast %52 : vector<1x8x256xf32> to vector<8x256xf32>
    %54 = arith.addf %50, %53 : vector<8x256xf32>
    %55 = vector.broadcast %51 : vector<8x1xf32> to vector<8x256xf32>
    %56 = arith.mulf %54, %55 : vector<8x256xf32>
    %c0_46 = arith.constant 0 : index
    %c0_47 = arith.constant 0 : index
    %c0_48 = arith.constant 0 : index
    %57 = vector.load %arg9[%c0_46, %c0_47, %c0_48] : memref<1x8x256xf32, #tpu.memory_space<vmem>>, vector<1x8x256xf32>
    %58 = vector.shape_cast %57 : vector<1x8x256xf32> to vector<8x256xf32>
    %59 = vector.shape_cast %56 : vector<8x256xf32> to vector<1x8x256xf32>
    tpu.vector_store %arg9[%c0_46, %c0_47, %c0_48], %59 {strides = array<i32>} : memref<1x8x256xf32, #tpu.memory_space<vmem>>, vector<1x8x256xf32>,
    %c0_49 = arith.constant 0 : index
    %c0_50 = arith.constant 0 : index
    %60 = vector.load %arg7[%c0_49, %c0_50] : memref<8x8xf32, #tpu.memory_space<vmem>>, vector<8x8xf32>
    %cst_51 = arith.constant dense<0.000000e+00> : vector<8x256xf32>
    %61 = tpu.matmul %60, %50, %cst_51 {dimension_numbers = #tpu.dot_dimension_numbers<[1], [0], [0], [1], [0, 0, 1, 1], [], []>} : vector<8x8xf32>, vector<8x256xf32>, vector<8x256xf32> -> vector<8x256xf32>
    %c0_52 = arith.constant 0 : index
    %c2_53 = arith.constant 2 : index
    %62 = vector.load %arg8[%c0_52, %c2_53] : memref<16x4xf32, #tpu.memory_space<vmem>>, vector<8x1xf32>
    %63 = vector.broadcast %62 : vector<8x1xf32> to vector<8x256xf32>
    %64 = arith.addf %61, %63 : vector<8x256xf32>
    %c0_54 = arith.constant 0 : index
    %c0_55 = arith.constant 0 : index
    %c0_56 = arith.constant 0 : index
    %65 = vector.load %arg10[%c0_54, %c0_55, %c0_56] : memref<1x8x256xf32, #tpu.memory_space<vmem>>, vector<1x8x256xf32>
    %66 = vector.shape_cast %65 : vector<1x8x256xf32> to vector<8x256xf32>
    %67 = vector.shape_cast %64 : vector<8x256xf32> to vector<1x8x256xf32>
    tpu.vector_store %arg10[%c0_54, %c0_55, %c0_56], %67 {strides = array<i32>} : memref<1x8x256xf32, #tpu.memory_space<vmem>>, vector<1x8x256xf32>,
    %c0_57 = arith.constant 0 : index
    %c256 = arith.constant 256 : index
    %68 = vector.load %arg11[%c0_57, %c256] : memref<8x384xf32, #tpu.memory_space<vmem>>, vector<8x128xf32>
    %c0_58 = arith.constant 0 : index
    %c0_59 = arith.constant 0 : index
    %69 = vector.load %arg11[%c0_58, %c0_59] : memref<8x384xf32, #tpu.memory_space<vmem>>, vector<8x128xf32>
    tpu.vector_store %arg11[%c0_58, %c0_59], %68 {strides = array<i32>} : memref<8x384xf32, #tpu.memory_space<vmem>>, vector<8x128xf32>,
    return
  }
  func.func @transform_0(%arg0: i32, %arg1: i32, %arg2: i32) -> (i32, i32, i32) {
    %c2_i32 = arith.constant 2 : i32
    %0 = arith.muli %arg0, %c2_i32 : i32
    %1 = arith.addi %0, %arg2 : i32
    %c0_i32 = arith.constant 0 : i32
    %c0_i32_0 = arith.constant 0 : i32
    return %arg1, %c0_i32, %1 : i32, i32, i32
  }
  func.func @transform_1(%arg0: i32, %arg1: i32, %arg2: i32) -> (i32, i32, i32, i32) {
    %c0_i32 = arith.constant 0 : i32
    %c0_i32_0 = arith.constant 0 : i32
    %c0_i32_1 = arith.constant 0 : i32
    return %arg0, %arg1, %c0_i32, %c0_i32_0 : i32, i32, i32, i32
  }
  func.func @transform_2(%arg0: i32, %arg1: i32, %arg2: i32) -> (i32, i32, i32) {
    %c0_i32 = arith.constant 0 : i32
    %c0_i32_0 = arith.constant 0 : i32
    %c0_i32_1 = arith.constant 0 : i32
    %c0_i32_2 = arith.constant 0 : i32
    return %c0_i32, %c0_i32_0, %c0_i32_1 : i32, i32, i32
  }
  func.func @transform_3(%arg0: i32, %arg1: i32, %arg2: i32) -> (i32, i32) {
    %c0_i32 = arith.constant 0 : i32
    %c0_i32_0 = arith.constant 0 : i32
    %c0_i32_1 = arith.constant 0 : i32
    return %c0_i32, %c0_i32_0 : i32, i32
  }
  func.func @transform_4(%arg0: i32, %arg1: i32, %arg2: i32) -> (i32, i32) {
    %c0_i32 = arith.constant 0 : i32
    %c0_i32_0 = arith.constant 0 : i32
    %c0_i32_1 = arith.constant 0 : i32
    return %c0_i32, %c0_i32_0 : i32, i32
  }
  func.func @transform_5(%arg0: i32, %arg1: i32, %arg2: i32) -> (i32, i32) {
    %c0_i32 = arith.constant 0 : i32
    %c0_i32_0 = arith.constant 0 : i32
    %c0_i32_1 = arith.constant 0 : i32
    return %c0_i32, %c0_i32_0 : i32, i32
  }
  func.func @transform_6(%arg0: i32, %arg1: i32, %arg2: i32) -> (i32, i32, i32) {
    %c2_i32 = arith.constant 2 : i32
    %0 = arith.muli %arg0, %c2_i32 : i32
    %1 = arith.addi %0, %arg2 : i32
    %c0_i32 = arith.constant 0 : i32
    %c0_i32_0 = arith.constant 0 : i32
    return %arg1, %c0_i32, %1 : i32, i32, i32
  }
  func.func @transform_7(%arg0: i32, %arg1: i32, %arg2: i32) -> (i32, i32, i32) {
    %c2_i32 = arith.constant 2 : i32
    %0 = arith.muli %arg0, %c2_i32 : i32
    %1 = arith.addi %0, %arg2 : i32
    %c0_i32 = arith.constant 0 : i32
    %c0_i32_0 = arith.constant 0 : i32
    return %arg1, %c0_i32, %1 : i32, i32, i32
  }
}

</mosaic_0001>

<bundles_post_ra>
// kernel: tpu_custom_call.1
= control target key start
LH: loop header
LB: loop body
LE: loop exit
PB: predicated region body
PF: predicated region fallthrough
CT: control target
= control target key end

     0   :  { %13 = vsyncpa [#allocation4], 0  ;;  %s2841_s0 = inlined_call_operand.vmem [shape: f32[2,8,512], index: 0, kind: input, shape index: {}]   ;;  %s2842_s1 = inlined_call_operand.vmem [shape: f32[1,2,8,128], index: 1, kind: input, shape index: {}]   ;;  %s2843_s2 = inlined_call_operand.vmem [shape: f32[7,16,8], index: 2, kind: input, shape index: {}]   ;;  %s2844_s3 = inlined_call_operand.vmem [shape: f32[8,16], index: 3, kind: input, shape index: {}]   ;;  %s2845_s4 = inlined_call_operand.vmem [shape: f32[8,8], index: 4, kind: input, shape index: {}]   ;;  %s2846_s5 = inlined_call_operand.vmem [shape: f32[16,4], index: 5, kind: input, shape index: {}]   ;;  %s2847_s6 = inlined_call_operand.hbm [shape: f32[2,8,512], index: 6, kind: output, shape index: {0}]   ;;  %s2848_s7 = inlined_call_operand.hbm [shape: f32[2,8,512], index: 7, kind: output, shape index: {1}]  }
   0x1   :  { %15 = vsyncpa [#allocation4 + $0x1], 0 }
   0x2   :  { %16 = vsyncpa [#allocation6], 0 }
   0x3   :  { %18 = vsyncpa [#allocation6 + $0x1], 0  ;;  %s2262_s24 = smov 0   ;;  %s2264_s25 = smov 0  }
   0x4   :  { %s2266_s26 = smov 0   ;;  %s2268_s27 = smov 0  }
   0x5   :  { %s2270_s28 = smov 0   ;;  %s2272_s29 = smov 0  }
   0x6   :  { %s2274_s30 = smov 0   ;;  %s2276_s8 = smov 0  }
   0x7 LB: > { %2855 = sst [smem:[#allocation9_spill]] %s2177_s25  ;;  %s1881_s9 = sadd.s32 4294967295, %s2201_s8   ;;  %s2201_s8 = sphi %s2276_s8, %s24_s8   ;;  %s2197_s30 = sphi %s2274_s30, %s2878_s30   ;;  %s2193_s29 = sphi %s2272_s29, %s2877_s29   ;;  %s2189_s28 = sphi %s2270_s28, %s2876_s28   ;;  %s2185_s27 = sphi %s2268_s27, %s2875_s27   ;;  %s2181_s26 = sphi %s2266_s26, %s2874_s26   ;;  %s2177_s25 = sphi %s2264_s25, %s2873_s25   ;;  %s2173_s24 = sphi %s2262_s24, %s2872_s24  }
   0x8   : > { %2856 = sst [smem:[#allocation10_spill]] %s2181_s26  ;;  %s1882_s10 = sadd.s32 4294967294, %s2201_s8  }
   0x9   : > { %2857 = sst [smem:[#allocation11_spill]] %s2193_s29  ;;  %s36_s11 = sadd.s32 1, %s2193_s29 }
   0xa   : > { %2858 = sst [smem:[#allocation12_spill]] %s2197_s30  ;;  %p37_p0 = scmp.ge.s32.totalorder %s36_s11, 2 }
   0xb   : > { %s39_s12 = sadd.s32 1, %s2197_s30  ;;  %p210_p1 = scmp.ne.s32.totalorder %s2181_s26, %s2177_s25 }
   0xc   : > { %p211_p2 = scmp.eq.s32.totalorder %s1881_s9, 3  ;;  %s2880_s11 = smov (%p37_p0, %s36_s11), 0 }
   0xd   : > { %2859 = sst [smem:[#allocation13_spill]] %s2880_s11  ;;  %s2882_s12 = smov (!%p37_p0, %s39_s12), %s2197_s30 }
   0xe   : > { %s196_s13 = ssub.s32 %s2193_s29, %s2880_s11  ;;  %p2313_p3 = por %p211_p2, %p210_p1 }
   0xf   : > { %p41_p4 = scmp.ge.s32.totalorder %s2882_s12, 2  ;;  %p216_p5 = scmp.ne.s32.totalorder %s2177_s25, %s2173_s24 }
  0x10   : > { %p217_p6 = scmp.eq.s32.totalorder %s1882_s10, 3  ;;  %p1885_p7 = scmp.ge.s32.totalorder %s2201_s8, 1 }
  0x11   : > { %s2884_s12 = smov (%p41_p4, %s2882_s12), 0  ;;  %p307_p9 = scmp.lt.s32.totalorder %s2201_s8, 5 }
  0x12   : > { %2861 = sst [smem:[#allocation14_spill]] %s2884_s12  ;;  %p2322_p8 = por %p217_p6, %p216_p5 }
  0x13   : > { %s195_s16 = ssub.s32 %s2197_s30, %s2884_s12  ;;  %s200_s17 = sadd.s32 1, %s2181_s26 }
  0x14   : > { %s197_s18 = sor.u32 %s196_s13, %s195_s16  ;;  %p308_p10 = pnand %p1885_p7, %p307_p9 }
  0x15   : > { %p198_p11 = scmp.eq.s32.totalorder %s197_s18, 0  ;;  %s2334_s20 = sand.u32 (!%p308_p10), 1, %s2177_s25  }
  0x16   : > { %311 = sbr.rel (%p308_p10) target bundleno = 933 (0x3a5), region = 44  ;;  %s2337_s21 = sshll.u32 (!%p308_p10), %s2185_s27, 1 }
  0x17   : > { %s2331_s19 = scalar_select %p198_p11, %s2181_s26, %s200_s17  }
  0x18   : > { %s1886_s22 = sshll.u32 (!%p308_p10), %s2334_s20, 4  ;;  %p361_p12 = scmp.lt.s32.totalorder (!%p308_p10), %s2189_s28, 1 }
  0x19   : > { %2863 = sst [smem:[#allocation15_spill]] %s2331_s19  ;;  %p363_p13 = scmp.lt.s32.totalorder (!%p308_p10), %s2337_s21, 3 }
  0x1a   : > { %s2352_s26 = scalar_lea.vmem (!%p308_p10), [#allocation3], %s1886_s22  ;;  %s2354_s25 = scalar_lea.vmem (!%p308_p10), [#allocation5], %s1886_s22 }
  0x1b   : > { %s362_s23 = scalar_select %p361_p12, %s2189_s28, 1 }
  0x1c   : > { %s364_s13 = scalar_select %p363_p13, %s2337_s21, 3 }
  0x1d   : > { %s1889_s9 = sshll.u32 %s362_s23, 2  ;;  %s1891_s10 = sshll.u32 %s362_s23, 3 }
  0x1e   : > { %s379_s18 = scalar_lea.vmem %s2842_s1, %s1891_s10  ;;  %s366_s12 = sadd.s32 %s1889_s9, %s364_s13 }
  0x1f   : > { %s1890_s11 = sshll.u32 %s366_s12, 3  ;;  %p1892_p0 = scmp.ne.s32.totalorder %s2185_s27, 0 }
  0x20   : > { %s2350_s19 = scalar_lea.vmem %s2841_s0, %s1890_s11 }
  0x21   : > { %389 = sbr.rel (%p1892_p0) target bundleno = 40 (0x28), region = 48 }
  0x26   : > { %v390_v0 = vld [vmem:[%s379_s18] sm:$0xff] }
  0x27   : > { %391 = vst [vmem:[#allocation2 + $0x10] sm:$0xff] %v390_v0 }
  0x28 PF: > { %v2358_v2 = vld [vmem:[%s2350_s19 + $0x8] sm:$0xff]  ;;  %v2361_v3 = vld [vmem:[%s2350_s19] sm:$0xff]  ;;  %s2203_s29 = smov 10   ;;  %v2204_v4 = vmov 0.0   ;;  %s2205_s27 = smov 12   ;;  %v2210_v5 = vmov 0  }
  0x29   : > { %409 = vrot.lane.b32.xlu0 %v2361_v3, %s2203_s29  ;;  %489 = vmatprep.mubr.f32.mxu0 %v2204_v4  ;;  %s2206_s30 = smov 8   ;;  %s2207_s11 = smov 6   ;;  %v2381_v6 = vld [vmem:[%s2846_s5] sm:$0xff]  ;;  %v1090_v7 = vld [vmem:[%s2846_s5 + $0x8] sm:$0xff]  ;;  %vm413_vm0 = vcmask 80896   ;;  %v1893_v13 = vld [vmem:[%s2843_s2 + $0x10] sm:$0xff] }
  0x2a   : > { %583 = vmatprep.mubr.f32.mxu1 %v2204_v4  ;;  %s2208_s12 = smov 4   ;;  %s2209_s22 = smov 2   ;;  %2057 = vset.pattern.permute.xlu1 %v2210_v5  ;;  %vm418_vm1 = vcmask 64512   ;;  %vm508_vm2 = vcmask 97280   ;;  %v1894_v19 = vld [vmem:[%s2843_s2 + $0x18] sm:$0xff]  ;;  %v399_v20 = vld [vmem:[%s2843_s2] sm:$0xff] }
  0x2b   : > { %2056 = vset.pattern.permute.xlu0 %v2210_v5  ;;  %v400_v24 = vld [vmem:[%s2843_s2 + $0x8] sm:$0xff]  ;;  %v1899_v27 = vld [vmem:[%s2843_s2 + $0x20] sm:$0xff]  ;;  %vm705_vm3 = vcmask 48128   ;;  %v1903_v34 = vld [vmem:[%s2843_s2 + $0x30] sm:$0xff]  ;;  %vm806_vm4 = vcmask 31744   ;;  %vm907_vm5 = vcmask 15360  }
  0x2c   : > { %v1900_v31 = vld [vmem:[%s2843_s2 + $0x28] sm:$0xff]  ;;  %v1904_v38 = vld [vmem:[%s2843_s2 + $0x38] sm:$0xff]  ;;  %v1907_v41 = vld [vmem:[%s2843_s2 + $0x40] sm:$0xff]  ;;  %s1724_s23 = sshll.u32 %s2352_s26, 4  ;;  %s1701_s17 = scalar_lea.sflag [#allocation4], %s2334_s20  ;;  %s1725_s23 = int_to_ptr.vmem [resolvable:$true] %s1724_s23 }
  0x2d   : > { %411 = vrot.lane.b32.xlu0 %v2358_v2, %s2203_s29  ;;  %v1908_v45 = vld [vmem:[%s2843_s2 + $0x48] sm:$0xff]  ;;  %v1911_v48 = vld [vmem:[%s2843_s2 + $0x50] sm:$0xff]  ;;  %v1915_v49 = vld [vmem:[%s2843_s2 + $0x60] sm:$0xff]  ;;  %s2079_s18 = scalar_lea.vmem %s1725_s23, 256 }
  0x2e   : > { %v396_v1 = vld [vmem:[#allocation2 + $0x10] sm:$0xff]  ;;  %v1912_v50 = vld [vmem:[%s2843_s2 + $0x58] sm:$0xff]  ;;  %v1916_v51 = vld [vmem:[%s2843_s2 + $0x68] sm:$0xff]  ;;  %p2080_p1 = scmp.ne.s32.totalorder %s1725_s23, %s2079_s18 }
  0x2f   : > { %407 = vrot.lane.b32.xlu1 %v396_v1, %s2203_s29  ;;  %1699 = vst [vmem:[#allocation2 + $0x10] sm:$0xff] %v2358_v2  ;;  %s2220_s29 = smov [#allocation3]  }
  0x30   : > { %p2081_p2 = pnand %p2080_p1, %p2313_p3 }
  0x31   : > { %506 = vrot.lane.b32.xlu0 %v2358_v2, %s2205_s27 }
  0x32   : > { %p2082_p4 = pneg %p2081_p2 }
  0x33   : > { %502 = vrot.lane.b32.xlu1 %v396_v1, %s2205_s27 }
  0x35   : > { %601 = vrot.lane.b32.xlu0 %v2361_v3, %s2206_s30 }
  0x37   : > { %504 = vrot.lane.b32.xlu1 %v2361_v3, %s2205_s27 }
  0x39   : > { %599 = vrot.lane.b32.xlu0 %v396_v1, %s2206_s30 }
  0x3b   : > { %603 = vrot.lane.b32.xlu1 %v2358_v2, %s2206_s30 }
  0x3d   : > { %703 = vrot.lane.b32.xlu0 %v2358_v2, %s2207_s11 }
  0x3f   : > { %701 = vrot.lane.b32.xlu1 %v2361_v3, %s2207_s11 }
  0x41   : > { %802 = vrot.lane.b32.xlu0 %v2361_v3, %s2208_s12 }
  0x43   : > { %699 = vrot.lane.b32.xlu1 %v396_v1, %s2207_s11 }
  0x45   : > { %800 = vrot.lane.b32.xlu0 %v396_v1, %s2208_s12 }
  0x47   : > { %804 = vrot.lane.b32.xlu1 %v2358_v2, %s2208_s12 }
  0x49   : > { %905 = vrot.lane.b32.xlu0 %v2358_v2, %s2209_s22 }
  0x4b   : > { %903 = vrot.lane.b32.xlu1 %v2361_v3, %s2209_s22 }
  0x4d   : > { %1098 = vperm.xlu0 %2056, %v1090_v7  }
  0x4f   : > { %901 = vrot.lane.b32.xlu1 %v396_v1, %s2209_s22  ;;  %s1940_s22 = sshll.u32 %s2189_s28, 2  ;;  %s2083_s28 = sshll.u32 %s2220_s29, 4  ;;  %s2084_s28 = int_to_ptr.vmem [resolvable:$false] %s2083_s28 }
  0x50   : > { %p2086_p5 = scmp.lt.s32.totalorder %s1725_s23, %s2084_s28 }
  0x53   : > { %1093 = vperm.xlu1 %2057, %v2381_v6  }
  0x9b   : > { %v410_v9 = vpop.permute.xlu0 %409 }
  0x9f   : > { %v412_v11 = vpop.permute.xlu0 %411 }
  0xa0   : > { %v415_v12 = vsel %vm413_vm0, %v410_v9, %v412_v11 }
  0xa1   : > { %v408_v8 = vpop.permute.xlu1 %407  ;;  %455 = vmatprep.subr.mxu0 %v415_v12 }
  0xa2   : > { %v414_v14 = vsel %vm413_vm0, %v408_v8, %v410_v9 }
  0xa3   : > { %456 = vmatpush1.msra.mxu0 %v414_v14  ;;  %v507_v16 = vpop.permute.xlu0 %506 }
  0xa4   : > { %1895 = vmatmul.mubr.msk.f32.vlgmr.msra.gmra.mxu0 %vm418_vm1, %v1893_v13 }
  0xa5   : > { %v503_v10 = vpop.permute.xlu1 %502  ;;  %495 = vmatprep.mubr.f32.mxu0 %v2204_v4 }
  0xa7   : > { %v602_v22 = vpop.permute.xlu0 %601 }
  0xa8   : > { %1896 = vmatmul.mubr.msk.f32.gmra.mxu0 %vm418_vm1, %v1894_v19 }
  0xa9   : > { %v505_v15 = vpop.permute.xlu1 %504  ;;  %679 = vmatprep.mubr.f32.mxu0 %v2204_v4 }
  0xaa   : > { %v510_v17 = vsel %vm508_vm2, %v505_v15, %v507_v16  ;;  %v509_v18 = vsel %vm508_vm2, %v503_v10, %v505_v15 }
  0xab   : > { %549 = vmatprep.subr.mxu1 %v510_v17  ;;  %v600_v26 = vpop.permute.xlu0 %599 }
  0xac   : > { %550 = vmatpush1.msra.mxu1 %v509_v18  ;;  %v605_v28 = vsel %vm418_vm1, %v600_v26, %v602_v22 }
  0xad   : > { %v604_v21 = vpop.permute.xlu1 %603  ;;  %1897 = vmatmul.mubr.msk.f32.vlgmr.msra.gmra.mxu1 %vm418_vm1, %v399_v20 }
  0xae   : > { %v606_v23 = vsel %vm418_vm1, %v602_v22, %v604_v21  ;;  %589 = vmatprep.mubr.f32.mxu1 %v2204_v4 }
  0xaf   : > { %645 = vmatprep.subr.mxu0 %v606_v23  ;;  %v704_v30 = vpop.permute.xlu0 %703 }
  0xb0   : > { %646 = vmatpush1.msra.mxu0 %v605_v28 }
  0xb1   : > { %v702_v25 = vpop.permute.xlu1 %701  ;;  %1898 = vmatmul.mubr.msk.f32.gmra.mxu1 %vm418_vm1, %v400_v24  ;;  %1901 = vmatmul.mubr.msk.f32.vlgmr.msra.gmra.mxu0 %vm418_vm1, %v1899_v27 }
  0xb2   : > { %780 = vmatprep.mubr.f32.mxu1 %v2204_v4  ;;  %685 = vmatprep.mubr.f32.mxu0 %v2204_v4  ;;  %v707_v33 = vsel %vm705_vm3, %v702_v25, %v704_v30 }
  0xb3   : > { %746 = vmatprep.subr.mxu1 %v707_v33  ;;  %v803_v36 = vpop.permute.xlu0 %802 }
  0xb5   : > { %v700_v29 = vpop.permute.xlu1 %699  ;;  %1902 = vmatmul.mubr.msk.f32.gmra.mxu0 %vm418_vm1, %v1900_v31 }
  0xb6   : > { %v706_v32 = vsel %vm705_vm3, %v700_v29, %v702_v25  ;;  %881 = vmatprep.mubr.f32.mxu0 %v2204_v4 }
  0xb7   : > { %747 = vmatpush1.msra.mxu1 %v706_v32  ;;  %v801_v40 = vpop.permute.xlu0 %800 }
  0xb8   : > { %1905 = vmatmul.mubr.msk.f32.vlgmr.msra.gmra.mxu1 %vm418_vm1, %v1903_v34  ;;  %v807_v42 = vsel %vm806_vm4, %v801_v40, %v803_v36 }
  0xb9   : > { %v805_v35 = vpop.permute.xlu1 %804  ;;  %786 = vmatprep.mubr.f32.mxu1 %v2204_v4 }
  0xba   : > { %v808_v37 = vsel %vm806_vm4, %v803_v36, %v805_v35 }
  0xbb   : > { %847 = vmatprep.subr.mxu0 %v808_v37  ;;  %v906_v44 = vpop.permute.xlu0 %905 }
  0xbc   : > { %1906 = vmatmul.mubr.msk.f32.gmra.mxu1 %vm418_vm1, %v1904_v38  ;;  %848 = vmatpush1.msra.mxu0 %v807_v42 }
  0xbd   : > { %v904_v39 = vpop.permute.xlu1 %903  ;;  %982 = vmatprep.mubr.f32.mxu1 %v2204_v4  ;;  %1909 = vmatmul.mubr.msk.f32.vlgmr.msra.gmra.mxu0 %vm418_vm1, %v1907_v41 }
  0xbe   : > { %1038 = vmatprep.subr.mxu0 %v2358_v2  ;;  %887 = vmatprep.mubr.f32.mxu0 %v2204_v4  ;;  %v909_v47 = vsel %vm907_vm5, %v904_v39, %v906_v44 }
  0xbf   : > { %1039 = vmatpush1.msra.mxu0 %v2361_v3  ;;  %948 = vmatprep.subr.mxu1 %v909_v47 }
  0xc1   : > { %v902_v43 = vpop.permute.xlu1 %901  ;;  %1910 = vmatmul.mubr.msk.f32.gmra.mxu0 %vm418_vm1, %v1908_v45 }
  0xc2   : > { %v908_v46 = vsel %vm907_vm5, %v902_v43, %v904_v39  ;;  %1072 = vmatprep.mubr.f32.mxu0 %v2204_v4 }
  0xc3   : > { %949 = vmatpush1.msra.mxu1 %v908_v46 }
  0xc4   : > { %1913 = vmatmul.mubr.msk.f32.vlgmr.msra.gmra.mxu1 %vm418_vm1, %v1911_v48 }
  0xc5   : > { %988 = vmatprep.mubr.f32.mxu1 %v2204_v4  ;;  %1917 = vmatmul.mubr.msk.f32.vlgmr.msra.gmra.mxu0 %vm418_vm1, %v1915_v49 }
  0xc6   : > { %1078 = vmatprep.mubr.f32.mxu0 %v2204_v4 }
  0xc8   : > { %1914 = vmatmul.mubr.msk.f32.gmra.mxu1 %vm418_vm1, %v1912_v50  ;;  %v1099_v44 = vpop.permute.xlu0 %1098 }
  0xc9   : > { %1596 = vmatprep.mubr.f32.mxu1 %v2204_v4  ;;  %1918 = vmatmul.mubr.msk.f32.gmra.mxu0 %vm418_vm1, %v1916_v51 }
  0xce   : > { %v1094_v30 = vpop.permute.xlu1 %1093 }
 0x164   : > { %v491_v52 = vpop.f32.mrf.mxu0 }
 0x166   : > { %v493_v53 = vpop.f32.mrf.mxu0 }
 0x168   : > { %v497_v54 = vpop.f32.mrf.mxu0 }
 0x16a   : > { %v499_v57 = vpop.f32.mrf.mxu0 }
 0x16d   : > { %v585_v55 = vpop.f32.mrf.mxu1 }
 0x16e   : > { %v586_v1 = vadd.f32 %v585_v55, %v491_v52 }
 0x16f   : > { %v587_v56 = vpop.f32.mrf.mxu1 }
 0x170   : > { %v588_v5 = vadd.f32 %v587_v56, %v493_v53 }
 0x171   : > { %v591_v58 = vpop.f32.mrf.mxu1  ;;  %v681_v59 = vpop.f32.mrf.mxu0 }
 0x172   : > { %v692_v7 = vadd.f32 %v681_v59, %v586_v1  ;;  %v592_v9 = vadd.f32 %v591_v58, %v497_v54 }
 0x173   : > { %v683_v60 = vpop.f32.mrf.mxu0  ;;  %v593_v61 = vpop.f32.mrf.mxu1 }
 0x174   : > { %v693_v10 = vadd.f32 %v683_v60, %v588_v5  ;;  %v594_v14 = vadd.f32 %v593_v61, %v499_v57 }
 0x175   : > { %v687_v63 = vpop.f32.mrf.mxu0 }
 0x176   : > { %v694_v15 = vadd.f32 %v687_v63, %v592_v9  ;;  %v2211_v9 = vmov 683565275  }
 0x177   : > { %v689_v2 = vpop.f32.mrf.mxu0 }
 0x178   : > { %v782_v62 = vpop.f32.mrf.mxu1  ;;  %v695_v20 = vadd.f32 %v689_v2, %v594_v14 }
 0x179   : > { %v793_v11 = vadd.f32 %v782_v62, %v692_v7 }
 0x17a   : > { %v784_v0 = vpop.f32.mrf.mxu1 }
 0x17b   : > { %v794_v16 = vadd.f32 %v784_v0, %v693_v10 }
 0x17c   : > { %v788_v3 = vpop.f32.mrf.mxu1 }
 0x17d   : > { %v883_v8 = vpop.f32.mrf.mxu0  ;;  %v795_v21 = vadd.f32 %v788_v3, %v694_v15  ;;  %v2213_v15 = vmov 2131351028  }
 0x17e   : > { %v790_v13 = vpop.f32.mrf.mxu1  ;;  %v894_v17 = vadd.f32 %v883_v8, %v793_v11  ;;  %v2212_v11 = vmov 2475754826  }
 0x17f   : > { %v885_v12 = vpop.f32.mrf.mxu0  ;;  %v796_v26 = vadd.f32 %v790_v13, %v695_v20 }
 0x180   : > { %v895_v22 = vadd.f32 %v885_v12, %v794_v16 }
 0x181   : > { %v889_v18 = vpop.f32.mrf.mxu0 }
 0x182   : > { %v896_v27 = vadd.f32 %v889_v18, %v795_v21  ;;  %v2214_v18 = vmov 2102212464   ;;  %v2215_v21 = vmov 920167782  }
 0x183   : > { %v891_v24 = vpop.f32.mrf.mxu0 }
 0x184   : > { %v984_v19 = vpop.f32.mrf.mxu1  ;;  %v897_v33 = vadd.f32 %v891_v24, %v796_v26  ;;  %v2216_v24 = vmov 1326507024  }
 0x185   : > { %v995_v23 = vadd.f32 %v984_v19, %v894_v17  ;;  %v1074_v29 = vpop.f32.mrf.mxu0 }
 0x186   : > { %v986_v25 = vpop.f32.mrf.mxu1 }
 0x187   : > { %v996_v28 = vadd.f32 %v986_v25, %v895_v22  ;;  %v1085_v31 = vadd.f32 %v1074_v29, %v995_v23  ;;  %v1076_v35 = vpop.f32.mrf.mxu0 }
 0x188   : > { %v990_v32 = vpop.f32.mrf.mxu1 }
 0x189   : > { %v997_v34 = vadd.f32 %v990_v32, %v896_v27  ;;  %v2460_v36 = vadd.f32 %v1094_v30, %v1085_v31  ;;  %v1086_v37 = vadd.f32 %v1076_v35, %v996_v28  ;;  %v1080_v40 = vpop.f32.mrf.mxu0 }
 0x18a   : > { %v992_v38 = vpop.f32.mrf.mxu1 }
 0x18b   : > { %v998_v39 = vadd.f32 %v992_v38, %v897_v33  ;;  %v1105_v41 = vand.u32 2147483647, %v2460_v36  ;;  %v1108_v42 = vand.u32 2139095040, %v2460_v36  ;;  %v2464_v43 = vadd.f32 %v1094_v30, %v1086_v37  ;;  %v1082_v46 = vpop.f32.mrf.mxu0 }
 0x18c   : > { %v1087_v45 = vadd.f32 %v1080_v40, %v997_v34 }
 0x18d   : > { %v1109_v47 = vshrl.u32 %v1108_v42, 23  ;;  %v1212_v48 = vand.u32 2139095040, %v2464_v43  ;;  %v1088_v49 = vadd.f32 %v1082_v46, %v998_v39  ;;  %v1112_v50 = vand.u32 8388607, %v1105_v41 }
 0x18e   : > { %v2469_v51 = vadd.f32 %v1099_v44, %v1087_v45 }
 0x18f   : > { %v1919_v52 = vadd.s32 4294967169, %v1109_v47  ;;  %v1213_v53 = vshrl.u32 %v1212_v48, 23  ;;  %v2471_v54 = vadd.f32 %v1099_v44, %v1088_v49  ;;  %v1113_v58 = vor.u32 8388608, %v1112_v50 }
 0x190   : > { %v1313_v55 = vand.u32 2147483647, %v2469_v51  ;;  %v1316_v56 = vand.u32 2139095040, %v2469_v51 }
 0x191   : > { %v1115_v57 = vadd.s32 1, %v1919_v52  ;;  %v1923_v59 = vadd.s32 4294967169, %v1213_v53  ;;  %v1420_v61 = vand.u32 2139095040, %v2471_v54  ;;  %v2478_v1 = vshll.u32 %v1113_v58, 8 }
 0x192   : > { %v1317_v60 = vshrl.u32 %v1316_v56, 23  ;;  %v1320_v63 = vand.u32 8388607, %v1313_v55 }
 0x193   : > { %vm1116_vm6 = vcmp.gt.s32.totalorder %v1115_v57, 0  ;;  %v2480_v3 = vadd.s32 1, %v1923_v59  ;;  %v1421_v7 = vshrl.u32 %v1420_v61, 23 }
 0x194   : > { %v1117_v62 = vsel %vm1116_vm6, %v1115_v57, 0  ;;  %v1927_v5 = vadd.s32 4294967169, %v1317_v60  ;;  %v1321_v13 = vor.u32 8388608, %v1320_v63 }
 0x195   : > { %v1119_v0 = vand.u32 31, %v1117_v62  ;;  %v1118_v8 = vshrl.u32 %v1117_v62, 5  ;;  %v1931_v35 = vadd.s32 4294967169, %v1421_v7  ;;  %vm1220_vm13 = vcmp.gt.s32.totalorder %v2480_v3, 0 }
 0x196   : > { %v1323_v29 = vadd.s32 1, %v1927_v5  ;;  %v2506_v60 = vshll.u32 %v1321_v13, 8 }
 0x197   : > { %v1120_v2 = vsub.s32 32, %v1119_v0  ;;  %v1122_v10 = vshll.u32 %v2211_v9, %v1119_v0  ;;  %v1125_v12 = vshll.u32 %v2212_v11, %v1119_v0  ;;  %v1128_v17 = vshll.u32 %v2213_v15, %v1119_v0 }
 0x198   : > { %v1131_v20 = vshll.u32 %v2214_v18, %v1119_v0  ;;  %v1134_v23 = vshll.u32 %v2215_v21, %v1119_v0  ;;  %vm1137_vm7 = vcmp.lt.s32.totalorder %v1118_v8, 1  ;;  %vm1140_vm8 = vcmp.lt.s32.totalorder %v1118_v8, 4 }
 0x199   : > { %v1123_v14 = vshrl.u32 %v2212_v11, %v1120_v2  ;;  %v1126_v16 = vshrl.u32 %v2213_v15, %v1120_v2  ;;  %v1129_v19 = vshrl.u32 %v2214_v18, %v1120_v2  ;;  %v1132_v22 = vshrl.u32 %v2215_v21, %v1120_v2 }
 0x19a   : > { %v1135_v25 = vshrl.u32 %v2216_v24, %v1120_v2  ;;  %v1121_v37 = vshrl.u32 %v2211_v9, %v1120_v2  ;;  %vm1139_vm9 = vcmp.lt.s32.totalorder %v1118_v8, 3  ;;  %vm1138_vm10 = vcmp.lt.s32.totalorder %v1118_v8, 2 }
 0x19b   : > { %v1124_v26 = vor.u32 %v1123_v14, %v1122_v10  ;;  %v1127_v27 = vor.u32 %v1126_v16, %v1125_v12  ;;  %v1130_v28 = vor.u32 %v1129_v19, %v1128_v17  ;;  %v1133_v30 = vor.u32 %v1132_v22, %v1131_v20 }
 0x19c   : > { %v1136_v31 = vor.u32 %v1135_v25, %v1134_v23  ;;  %vm1324_vm11 = vcmp.gt.s32.totalorder %v1323_v29, 0  ;;  %v1427_v57 = vadd.s32 1, %v1931_v35 }
 0x19d   : > { %v1142_v32 = vsel %vm1140_vm8, %v1130_v28, 2102212464  ;;  %v1145_v33 = vsel %vm1137_vm7, %v1124_v26, %v1127_v27  ;;  %v1149_v34 = vsel %vm1137_vm7, %v1127_v27, %v1130_v28  ;;  %v1146_v38 = vsel %vm1140_vm8, %v1133_v30, 920167782 }
 0x19e   : > { %v1150_v39 = vsel %vm1140_vm8, %v1136_v31, 1326507024  ;;  %v1147_v40 = vsel %vm1139_vm9, %v1130_v28, %v1146_v38  ;;  %v1141_v44 = vsel %vm1137_vm7, %v1121_v37, %v1124_v26  ;;  %v1143_v45 = vsel %vm1139_vm9, %v1127_v27, %v1142_v32 }
 0x19f   : > { %v1151_v42 = vsel %vm1139_vm9, %v1133_v30, %v1150_v39  ;;  %v1148_v46 = vsel %vm1138_vm10, %v1145_v33, %v1147_v40  ;;  %v1144_v53 = vsel %vm1138_vm10, %v1141_v44, %v1143_v45  ;;  %v1325_v56 = vsel %vm1324_vm11, %v1323_v29, 0 }
 0x1a0   : > { %v1152_v47 = vsel %vm1138_vm10, %v1149_v34, %v1151_v42  ;;  %v2498_v50 = vmul.u32.u64.low %v2478_v1, %v1148_v46  ;;  %v2499_v52 = vmul.u32.u64.high %v2478_v1, %v1148_v46, %v2498_v50  ;;  %v1327_v58 = vand.u32 31, %v1325_v56 }
 0x1a1   : > { %v2494_v48 = vmul.u32.u64.low %v2478_v1, %v1152_v47  ;;  %v2495_v49 = vmul.u32.u64.high %v2478_v1, %v1152_v47, %v2494_v48  ;;  %v1160_v61 = vmul.u32 %v2478_v1, %v1144_v53  ;;  %v1326_v62 = vshrl.u32 %v1325_v56, 5 }
 0x1a2   : > { %v1163_v59 = vadd.s32 1, %v2499_v52  ;;  %v1328_v63 = vsub.s32 32, %v1327_v58  ;;  %vm1428_vm14 = vcmp.gt.s32.totalorder %v1427_v57, 0  ;;  %v1330_v2 = vshll.u32 %v2211_v9, %v1327_v58 }
 0x1a3   : > { %vm1162_vm12 = vc.u32 %v2495_v49, %v2498_v50  ;;  %v1333_v5 = vshll.u32 %v2212_v11, %v1327_v58  ;;  %v1336_v7 = vshll.u32 %v2213_v15, %v1327_v58  ;;  %v1339_v13 = vshll.u32 %v2214_v18, %v1327_v58 }
 0x1a4   : > { %v1164_v0 = vsel %vm1162_vm12, %v1163_v59, %v2499_v52  ;;  %v1331_v10 = vshrl.u32 %v2212_v11, %v1328_v63  ;;  %v1334_v12 = vshrl.u32 %v2213_v15, %v1328_v63  ;;  %v1337_v1 = vshrl.u32 %v2214_v18, %v1328_v63 }
 0x1a5   : > { %v1165_v8 = vadd.s32 %v1164_v0, %v1160_v61  ;;  %v1340_v14 = vshrl.u32 %v2215_v21, %v1328_v63  ;;  %v1342_v16 = vshll.u32 %v2215_v21, %v1327_v58  ;;  %v1343_v17 = vshrl.u32 %v2216_v24, %v1328_v63 }
 0x1a6   : > { %v1329_v19 = vshrl.u32 %v2211_v9, %v1328_v63  ;;  %v1332_v20 = vor.u32 %v1331_v10, %v1330_v2  ;;  %v1335_v22 = vor.u32 %v1334_v12, %v1333_v5  ;;  %vm1345_vm15 = vcmp.lt.s32.totalorder %v1326_v62, 1 }
 0x1a7   : > { %v1166_v23 = vadd.s32 536870912, %v1165_v8  ;;  %v1338_v25 = vor.u32 %v1337_v1, %v1336_v7  ;;  %v1341_v26 = vor.u32 %v1340_v14, %v1339_v13  ;;  %v1344_v27 = vor.u32 %v1343_v17, %v1342_v16 }
 0x1a8   : > { %vm1346_vm0 = vcmp.lt.s32.totalorder %v1326_v62, 2  ;;  %vm1347_vm2 = vcmp.lt.s32.totalorder %v1326_v62, 3  ;;  %vm1348_vm3 = vcmp.lt.s32.totalorder %v1326_v62, 4  ;;  %v1353_v28 = vsel %vm1345_vm15, %v1332_v20, %v1335_v22 }
 0x1a9   : > { %v1350_v29 = vsel %vm1348_vm3, %v1338_v25, 2102212464  ;;  %v1354_v30 = vsel %vm1348_vm3, %v1341_v26, 920167782  ;;  %v1357_v31 = vsel %vm1345_vm15, %v1335_v22, %v1338_v25  ;;  %v1358_v32 = vsel %vm1348_vm3, %v1344_v27, 1326507024 }
 0x1aa   : > { %v1349_v33 = vsel %vm1345_vm15, %v1329_v19, %v1332_v20  ;;  %v1351_v34 = vsel %vm1347_vm2, %v1335_v22, %v1350_v29  ;;  %v1355_v35 = vsel %vm1347_vm2, %v1338_v25, %v1354_v30  ;;  %v1359_v37 = vsel %vm1347_vm2, %v1341_v26, %v1358_v32 }
 0x1ab   : > { %v2521_v38 = vshrl.u32 %v1166_v23, 30  ;;  %v1356_v39 = vsel %vm1346_vm0, %v1353_v28, %v1355_v35  ;;  %v1360_v40 = vsel %vm1346_vm0, %v1357_v31, %v1359_v37  ;;  %v1429_v42 = vsel %vm1428_vm14, %v1427_v57, 0 }
 0x1ac   : > { %v2529_v44 = vsel %vm1220_vm13, %v2480_v3, 0  ;;  %v2532_v45 = vmul.u32.u64.low %v2506_v60, %v1360_v40  ;;  %v2533_v46 = vmul.u32.u64.high %v2506_v60, %v1360_v40, %v2532_v45  ;;  %v1352_v47 = vsel %vm1346_vm0, %v1349_v33, %v1351_v34 }
 0x1ad   : > { %v2537_v48 = vmul.u32.u64.low %v2506_v60, %v1356_v39  ;;  %v2538_v52 = vmul.u32.u64.high %v2506_v60, %v1356_v39, %v2537_v48  ;;  %v1431_v53 = vand.u32 31, %v1429_v42  ;;  %v1168_v56 = vshll.u32 %v2521_v38, 30 }
 0x1ae   : > { %v2543_v57 = vand.u32 31, %v2529_v44  ;;  %v1417_v3 = vand.u32 2147483647, %v2471_v54  ;;  %v1368_v59 = vmul.u32 %v2506_v60, %v1352_v47  ;;  %v1430_v61 = vshrl.u32 %v1429_v42, 5 }
 0x1af   : > { %v1432_v58 = vsub.s32 32, %v1431_v53  ;;  %vm1370_vm4 = vc.u32 %v2533_v46, %v2537_v48  ;;  %v1443_v62 = vshll.u32 %v2214_v18, %v1431_v53  ;;  %v1371_v63 = vadd.s32 1, %v2538_v52 }
 0x1b0   : > { %v1446_v2 = vshll.u32 %v2215_v21, %v1431_v53  ;;  %v1434_v7 = vshll.u32 %v2211_v9, %v1431_v53  ;;  %v1437_v60 = vshll.u32 %v2212_v11, %v1431_v53  ;;  %v1424_v16 = vand.u32 8388607, %v1417_v3 }
 0x1b1   : > { %v1444_v0 = vshrl.u32 %v2215_v21, %v1432_v58  ;;  %v1447_v5 = vshrl.u32 %v2216_v24, %v1432_v58  ;;  %v1435_v10 = vshrl.u32 %v2212_v11, %v1432_v58  ;;  %v1438_v12 = vshrl.u32 %v2213_v15, %v1432_v58 }
 0x1b2   : > { %v1372_v13 = vsel %vm1370_vm4, %v1371_v63, %v2538_v52  ;;  %v2561_v17 = vsub.s32 %v1165_v8, %v1168_v56  ;;  %vm1452_vm5 = vcmp.lt.s32.totalorder %v1430_v61, 4  ;;  %v1440_v23 = vshll.u32 %v2213_v15, %v1431_v53 }
 0x1b3   : > { %v1445_v1 = vor.u32 %v1444_v0, %v1443_v62  ;;  %v1448_v14 = vor.u32 %v1447_v5, %v1446_v2  ;;  %v1373_v19 = vadd.s32 %v1372_v13, %v1368_v59  ;;  %v1436_v20 = vor.u32 %v1435_v10, %v1434_v7 }
 0x1b4   : > { %v1439_v22 = vor.u32 %v1438_v12, %v1437_v60  ;;  %v1441_v25 = vshrl.u32 %v2214_v18, %v1432_v58  ;;  %v2566_v26 = vsub.s32 32, %v2543_v57  ;;  %v1425_v30 = vor.u32 8388608, %v1424_v16 }
 0x1b5   : > { %v1374_v27 = vadd.s32 536870912, %v1373_v19  ;;  %v1458_v28 = vsel %vm1452_vm5, %v1445_v1, 920167782  ;;  %v1462_v29 = vsel %vm1452_vm5, %v1448_v14, 1326507024  ;;  %vm1449_vm6 = vcmp.lt.s32.totalorder %v1430_v61, 1 }
 0x1b6   : > { %v1442_v31 = vor.u32 %v1441_v25, %v1440_v23  ;;  %v1171_v8 = vsub.s32 0, %v2561_v17  ;;  %vm1451_vm7 = vcmp.lt.s32.totalorder %v1430_v61, 3  ;;  %v1457_v33 = vsel %vm1449_vm6, %v1436_v20, %v1439_v22 }
 0x1b7   : > { %v2569_v32 = vshrl.u32 %v1374_v27, 30  ;;  %v1463_v39 = vsel %vm1451_vm7, %v1445_v1, %v1462_v29  ;;  %v1236_v40 = vshrl.u32 %v2215_v21, %v2566_v26  ;;  %v1433_v45 = vshrl.u32 %v2211_v9, %v1432_v58 }
 0x1b8   : > { %v1454_v34 = vsel %vm1452_vm5, %v1442_v31, 2102212464  ;;  %v1459_v35 = vsel %vm1451_vm7, %v1442_v31, %v1458_v28  ;;  %v1461_v37 = vsel %vm1449_vm6, %v1439_v22, %v1442_v31  ;;  %vm1450_vm8 = vcmp.lt.s32.totalorder %v1430_v61, 2 }
 0x1b9   : > { %v1376_v42 = vshll.u32 %v2569_v32, 30  ;;  %v1239_v47 = vshrl.u32 %v2216_v24, %v2566_v26  ;;  %v1460_v52 = vsel %vm1450_vm8, %v1457_v33, %v1459_v35  ;;  %v1464_v53 = vsel %vm1450_vm8, %v1461_v37, %v1463_v39 }
 0x1ba   : > { %v1465_v56 = vshll.u32 %v1425_v30, 8  ;;  %v1920_v59 = vmin.u32 %v1171_v8, %v2561_v17  ;;  %v1453_v63 = vsel %vm1449_vm6, %v1433_v45, %v1436_v20  ;;  %v1455_v0 = vsel %vm1451_vm7, %v1439_v22, %v1454_v34 }
 0x1bb   : > { %v2582_v62 = vsub.s32 %v1373_v19, %v1376_v42  ;;  %v1235_v24 = vshll.u32 %v2214_v18, %v2543_v57  ;;  %v1238_v10 = vshll.u32 %v2215_v21, %v2543_v57  ;;  %v1456_v12 = vsel %vm1450_vm8, %v1453_v63, %v1455_v0 }
 0x1bc   : > { %v2586_v2 = vmul.u32.u64.low %v1465_v56, %v1464_v53  ;;  %v2587_v5 = vmul.u32.u64.high %v1465_v56, %v1464_v53, %v2586_v2  ;;  %v2589_v7 = vmul.u32.u64.low %v1465_v56, %v1460_v52  ;;  %v2590_v58 = vmul.u32.u64.high %v1465_v56, %v1460_v52, %v2589_v7 }
 0x1bd   : > { %v1379_v60 = vsub.s32 0, %v2582_v62  ;;  %v1209_v13 = vand.u32 2147483647, %v2464_v43  ;;  %v2600_v61 = vshrl.u32 %v2529_v44, 5  ;;  %v1237_v1 = vor.u32 %v1236_v40, %v1235_v24 }
 0x1be   : > { %v1240_v14 = vor.u32 %v1239_v47, %v1238_v10  ;;  %v1173_v19 = vclz %v1920_v59  ;;  %vm1474_vm9 = vc.u32 %v2587_v5, %v2589_v7  ;;  %v1475_v20 = vadd.s32 1, %v2590_v58 }
 0x1bf   : > { %v1928_v16 = vmin.u32 %v1379_v60, %v2582_v62  ;;  %v1227_v21 = vshrl.u32 %v2212_v11, %v2566_v26  ;;  %v1472_v23 = vmul.u32 %v1465_v56, %v1456_v12  ;;  %v1226_v25 = vshll.u32 %v2211_v9, %v2543_v57 }
 0x1c0   : > { %v1229_v44 = vshll.u32 %v2212_v11, %v2543_v57  ;;  %v1476_v27 = vsel %vm1474_vm9, %v1475_v20, %v2590_v58  ;;  %v1230_v28 = vshrl.u32 %v2213_v15, %v2566_v26  ;;  %v1232_v29 = vshll.u32 %v2213_v15, %v2543_v57 }
 0x1c1   : > { %v1381_v22 = vclz %v1928_v16  ;;  %v1233_v30 = vshrl.u32 %v2214_v18, %v2566_v26  ;;  %vm1244_vm10 = vcmp.lt.s32.totalorder %v2600_v61, 4  ;;  %v1477_v8 = vadd.s32 %v1476_v27, %v1472_v23 }
 0x1c2   : > { %v1216_v33 = vand.u32 8388607, %v1209_v13  ;;  %v1921_v34 = vadd.s32 4294967294, %v1173_v19  ;;  %v1228_v11 = vor.u32 %v1227_v21, %v1226_v25  ;;  %v1231_v35 = vor.u32 %v1230_v28, %v1229_v44 }
 0x1c3   : > { %v1929_v31 = vadd.s32 4294967294, %v1381_v22  ;;  %v1234_v37 = vor.u32 %v1233_v30, %v1232_v29  ;;  %v1250_v39 = vsel %vm1244_vm10, %v1237_v1, 920167782  ;;  %v1478_v40 = vadd.s32 536870912, %v1477_v8 }
 0x1c4   : > { %v1254_v15 = vsel %vm1244_vm10, %v1240_v14, 1326507024  ;;  %v1369_v18 = vadd.s32 %v2537_v48, %v2533_v46  ;;  %vm1241_vm12 = vcmp.lt.s32.totalorder %v2600_v61, 1  ;;  %vm1243_vm13 = vcmp.lt.s32.totalorder %v2600_v61, 3 }
 0x1c5   : > { %vm1930_vm11 = vcmp.lt.s32.totalorder %v1929_v31, 0  ;;  %v2629_v47 = vshrl.u32 %v1478_v40, 30  ;;  %vm1922_vm14 = vcmp.lt.s32.totalorder %v1921_v34, 0  ;;  %v1217_v52 = vor.u32 8388608, %v1216_v33 }
 0x1c6   : > { %v1384_v57 = vsel %vm1930_vm11, 0, %v1929_v31  ;;  %v1249_v53 = vsel %vm1241_vm12, %v1228_v11, %v1231_v35  ;;  %v1251_v56 = vsel %vm1243_vm13, %v1234_v37, %v1250_v39  ;;  %v1253_v48 = vsel %vm1241_vm12, %v1231_v35, %v1234_v37 }
 0x1c7   : > { %v1385_v42 = vsub.s32 32, %v1384_v57  ;;  %v1389_v45 = vsub.s32 4294967266, %v1384_v57  ;;  %v1480_v46 = vshll.u32 %v2629_v47, 30  ;;  %v1386_v0 = vshll.u32 %v2582_v62, %v1384_v57 }
 0x1c8   : > { %vm1242_vm15 = vcmp.lt.s32.totalorder %v2600_v61, 2  ;;  %v1246_v2 = vsel %vm1244_vm10, %v1234_v37, 2102212464  ;;  %v1255_v58 = vsel %vm1243_vm13, %v1237_v1, %v1254_v15  ;;  %v1225_v60 = vshrl.u32 %v2211_v9, %v2566_v26 }
 0x1c9   : > { %v1387_v59 = vshrl.u32 %v1369_v18, %v1385_v42  ;;  %v1390_v63 = vadd.s32 127, %v1389_v45  ;;  %v1481_v10 = vsub.s32 %v1477_v8, %v1480_v46  ;;  %v1252_v12 = vsel %vm1242_vm15, %v1249_v53, %v1251_v56 }
 0x1ca   : > { %v1176_v14 = vsel %vm1922_vm14, 0, %v1921_v34  ;;  %v1256_v62 = vsel %vm1242_vm15, %v1253_v48, %v1255_v58  ;;  %v1257_v19 = vshll.u32 %v1217_v52, 8  ;;  %v1245_v1 = vsel %vm1241_vm12, %v1225_v60, %v1228_v11 }
 0x1cb   : > { %v1391_v24 = vshll.u32 %v1390_v63, 23  ;;  %v1388_v16 = vor.u32 %v1387_v59, %v1386_v0  ;;  %v1483_v21 = vsub.s32 0, %v1481_v10  ;;  %v1247_v22 = vsel %vm1243_vm13, %v1231_v35, %v1246_v2 }
 0x1cc   : > { %v2656_v23 = vmul.u32.u64.low %v1257_v19, %v1256_v62  ;;  %v2657_v9 = vmul.u32.u64.high %v1257_v19, %v1256_v62, %v2656_v23  ;;  %v2659_v26 = vmul.u32.u64.low %v1257_v19, %v1252_v12  ;;  %v2660_v25 = vmul.u32.u64.high %v1257_v19, %v1252_v12, %v2659_v26 }
 0x1cd   : > { %v1392_v20 = vor.u32 4788187, %v1391_v24  ;;  %v1932_v27 = vmin.u32 %v1483_v21, %v1481_v10  ;;  %v1395_v28 = vcvt.s32.f32 %v1388_v16  ;;  %v1248_v29 = vsel %vm1242_vm15, %v1245_v1, %v1247_v22 }
 0x1ce   : > { %v1181_v30 = vsub.s32 4294967266, %v1176_v14  ;;  %v2217_v8 = vmov 1   ;;  %vm1266_vm0 = vc.u32 %v2657_v9, %v2659_v26  ;;  %v1267_v34 = vadd.s32 1, %v2660_v25 }
 0x1cf   : > { %v1393_v44 = vand.u32 2147483647, %v1392_v20  ;;  %v1485_v31 = vclz %v1932_v27  ;;  %2058 = vset.pattern.permute.xlu1 %v2217_v8  ;;  %v1264_v35 = vmul.u32 %v1257_v19, %v1248_v29  ;;  %v2218_v40 = vmov 3  }
 0x1d0   : > { %1525 = vperm.xlu1 %2058, %v2381_v6   ;;  %v1268_v37 = vsel %vm1266_vm0, %v1267_v34, %v2660_v25  ;;  %v1182_v39 = vadd.s32 127, %v1181_v30  ;;  %2059 = vset.pattern.permute.xlu0 %v2218_v40  ;;  %v1177_v57 = vsub.s32 32, %v1176_v14  ;;  %v1473_v42 = vadd.s32 %v2589_v7, %v2587_v5 }
 0x1d1   : > { %v1396_v33 = vmul.f32 %v1395_v28, %v1393_v44  ;;  %v1933_v11 = vadd.s32 4294967294, %v1485_v31  ;;  %v1269_v61 = vadd.s32 %v1268_v37, %v1264_v35  ;;  %1608 = vperm.xlu0 %2059, %v2381_v6   ;;  %v1161_v53 = vadd.s32 %v2498_v50, %v2495_v49 }
 0x1d2   : > { %vm1315_vm3 = vcmp.lt.s32.totalorder %v2469_v51, 0  ;;  %v1183_v59 = vshll.u32 %v1182_v39, 23  ;;  %vm2682_vm4 = vcmp.le.f32.partialorder %v1313_v55, 0.7853982  ;;  %v1178_v50 = vshll.u32 %v2561_v17, %v1176_v14 }
 0x1d3   : > { %vm1934_vm2 = vcmp.lt.s32.totalorder %v1933_v11, 0  ;;  %v1397_v15 = vxor.u32 2147483648, %v1396_v33  ;;  %v1270_v56 = vadd.s32 536870912, %v1269_v61  ;;  %v1179_v2 = vshrl.u32 %v1161_v53, %v1177_v57 }
 0x1d4   : > { %v1488_v18 = vsel %vm1934_vm2, 0, %v1933_v11  ;;  %v1184_v24 = vor.u32 4788187, %v1183_v59  ;;  %v1399_v1 = vsub.s32 4, %v2569_v32  ;;  %vm1419_vm5 = vcmp.lt.s32.totalorder %v2471_v54, 0 }
 0x1d5   : > { %v1489_v45 = vsub.s32 32, %v1488_v18  ;;  %v1493_v52 = vsub.s32 4294967266, %v1488_v18  ;;  %v1490_v63 = vshll.u32 %v1481_v10, %v1488_v18  ;;  %v1398_v0 = vsel %vm1315_vm3, %v1397_v15, %v1396_v33 }
 0x1d6   : > { %v2678_v6 = vshrl.u32 %v1270_v56, 30  ;;  %v1401_v60 = vsel %vm2682_vm4, %v2469_v51, %v1398_v0  ;;  %v1180_v16 = vor.u32 %v1179_v2, %v1178_v50  ;;  %v1185_v55 = vand.u32 2147483647, %v1184_v24 }
 0x1d7   : > { %v1491_v46 = vshrl.u32 %v1473_v42, %v1489_v45  ;;  %v1494_v48 = vadd.s32 127, %v1493_v52  ;;  %2062 = vcosq.f32 %v1401_v60  ;;  %v1503_v14 = vsub.s32 4, %v2629_v47 }
 0x1d8   : > { %v1272_v49 = vshll.u32 %v2678_v6, 30  ;;  %2064 = vsinq.f32 %v1401_v60  ;;  %v1187_v23 = vcvt.s32.f32 %v1180_v16  ;;  %vm2696_vm6 = vcmp.le.f32.partialorder %v1417_v3, 0.7853982 }
 0x1d9   : > { %v1492_v58 = vor.u32 %v1491_v46, %v1490_v63  ;;  %v1495_v5 = vshll.u32 %v1494_v48, 23  ;;  %v1400_v30 = vsel %vm1315_vm3, %v1399_v1, %v2569_v32  ;;  %v1504_v8 = vsel %vm1419_vm5, %v1503_v14, %v2629_v47 }
 0x1da   : > { %v1273_v12 = vsub.s32 %v1269_v61, %v1272_v49  ;;  %v1188_v44 = vmul.f32 %v1187_v23, %v1185_v55  ;;  %v1402_v3 = vsel %vm2682_vm4, 0, %v1400_v30  ;;  %v1265_v11 = vadd.s32 %v2659_v26, %v2657_v9  ;;  %v1615_v9 = vld [vmem:[%s2845_s4] sm:$0xff] }
 0x1db   : > { %v1496_v10 = vor.u32 4788187, %v1495_v5  ;;  %v1499_v19 = vcvt.s32.f32 %v1492_v58  ;;  %vm1107_vm8 = vcmp.lt.s32.totalorder %v2460_v36, 0  ;;  %v1506_v32 = vsel %vm2696_vm6, 0, %v1504_v8 }
 0x1dc   : > { %v1275_v20 = vsub.s32 0, %v1273_v12  ;;  %v1189_v33 = vxor.u32 2147483648, %v1188_v44  ;;  %v1406_v39 = vadd.s32 3, %v1402_v3  ;;  %v1510_v42 = vadd.s32 3, %v1506_v32 }
 0x1dd   : > { %v1497_v62 = vand.u32 2147483647, %v1496_v10  ;;  %vm2718_vm9 = vcmp.le.f32.partialorder %v1105_v41, 0.7853982  ;;  %vm1211_vm10 = vcmp.lt.s32.totalorder %v2464_v43, 0  ;;  %v1191_v50 = vsub.s32 4, %v2521_v38 }
 0x1de   : > { %v1924_v22 = vmin.u32 %v1275_v20, %v1273_v12  ;;  %v1190_v18 = vsel %vm1107_vm8, %v1189_v33, %v1188_v44  ;;  %v1407_v26 = vand.u32 3, %v1406_v39  ;;  %v1511_v46 = vand.u32 3, %v1510_v42  ;;  %v1521_v39 = vld [vmem:[%s2844_s3] sm:$0xff]  ;;  %v1604_v42 = vld [vmem:[%s2350_s19 + $0x8] sm:$0xff] }
 0x1df   : > { %v1500_v21 = vmul.f32 %v1499_v19, %v1497_v62  ;;  %v1193_v56 = vsel %vm2718_vm9, %v2460_v36, %v1190_v18  ;;  %vm2729_vm14 = vcmp.le.f32.partialorder %v1209_v13, 0.7853982  ;;  %v1295_v16 = vsub.s32 4, %v2678_v6 }
 0x1e0   : > { %v1277_v25 = vclz %v1924_v22  ;;  %vm1409_vm11 = vcmp.eq.s32.totalorder %v1407_v26, 0  ;;  %vm1412_vm12 = vcmp.eq.s32.totalorder %v1407_v26, 2  ;;  %vm1516_vm13 = vcmp.eq.s32.totalorder %v1511_v46, 2 }
 0x1e1   : > { %v1501_v17 = vxor.u32 2147483648, %v1500_v21  ;;  %vm1513_vm15 = vcmp.eq.s32.totalorder %v1511_v46, 0  ;;  %vm1408_vm0 = vcmp.lt.s32.totalorder %v1407_v26, 2  ;;  %vm1512_vm2 = vcmp.lt.s32.totalorder %v1511_v46, 2 }
 0x1e2   : > { %v1925_v31 = vadd.s32 4294967294, %v1277_v25  ;;  %vm1509_vm3 = vweird.f32 %v2471_v54  ;;  %vm1405_vm4 = vweird.f32 %v2469_v51  ;;  %v1296_v23 = vsel %vm1211_vm10, %v1295_v16, %v2678_v6 }
 0x1e3   : > { %v1502_v28 = vsel %vm1419_vm5, %v1501_v17, %v1500_v21  ;;  %v1192_v21 = vsel %vm1107_vm8, %v1191_v50, %v2521_v38  ;;  %v1298_v17 = vsel %vm2729_vm14, 0, %v1296_v23 }
 0x1e4   : > { %v1505_v29 = vsel %vm2696_vm6, %v2471_v54, %v1502_v28  ;;  %vm1926_vm7 = vcmp.lt.s32.totalorder %v1925_v31, 0  ;;  %v2063_v15 = vpop.eup %2062  ;;  %v1194_v54 = vsel %vm2718_vm9, 0, %v1192_v21  ;;  %v1302_v44 = vadd.s32 3, %v1298_v17 }
 0x1e5   : > { %2066 = vcosq.f32 %v1505_v29  ;;  %v1280_v34 = vsel %vm1926_vm7, 0, %v1925_v31  ;;  %v2065_v57 = vpop.eup %2064  ;;  %v1413_v63 = vxor.u32 2147483648, %v2063_v15  ;;  %v1198_v14 = vadd.s32 3, %v1194_v54 }
 0x1e6   : > { %2068 = vsinq.f32 %v1505_v29  ;;  %v1281_v35 = vsub.s32 32, %v1280_v34  ;;  %v1285_v37 = vsub.s32 4294967266, %v1280_v34  ;;  %v1282_v61 = vshll.u32 %v1273_v12, %v1280_v34 }
 0x1e7   : > { %v1410_v59 = vxor.u32 2147483648, %v2065_v57  ;;  %2070 = vcosq.f32 %v1193_v56  ;;  %v1414_v49 = vsel %vm1412_vm12, %v1413_v63, %v2065_v57  ;;  %v1199_v51 = vand.u32 3, %v1198_v14 }
 0x1e8   : > { %v1283_v47 = vshrl.u32 %v1265_v11, %v1281_v35  ;;  %v1286_v40 = vadd.s32 127, %v1285_v37  ;;  %2072 = vsinq.f32 %v1193_v56  ;;  %v1303_v29 = vand.u32 3, %v1302_v44 }
 0x1e9   : > { %v1411_v7 = vsel %vm1409_vm11, %v2063_v15, %v1410_v59  ;;  %vm1201_vm5 = vcmp.eq.s32.totalorder %v1199_v51, 0  ;;  %vm1204_vm6 = vcmp.eq.s32.totalorder %v1199_v51, 2  ;;  %vm1200_vm9 = vcmp.lt.s32.totalorder %v1199_v51, 2  ;;  %v1603_v15 = vld [vmem:[%s2350_s19] sm:$0xff]  ;;  %s2770_s19 = sadd.s32 %s1940_s22, %s2337_s21  ;;  %s2085_s21 = scalar_lea.vmem %s2084_s28, 512 }
 0x1ea   : > { %v1284_v45 = vor.u32 %v1283_v47, %v1282_v61  ;;  %v1287_v52 = vshll.u32 %v1286_v40, 23  ;;  %v1415_v19 = vsel %vm1408_vm0, %v1411_v7, %v1414_v49  ;;  %vm1308_vm7 = vcmp.eq.s32.totalorder %v1303_v29, 2  ;;  %s1941_s9 = sshll.u32 %s2770_s19, 7  ;;  %p2087_p6 = scmp.lt.s32.totalorder %s2085_s21, %s2079_s18 }
 0x1eb   : > { %v1416_v22 = vsel %vm1405_vm4, nan, %v1415_v19  ;;  %vm1305_vm8 = vcmp.eq.s32.totalorder %v1303_v29, 0  ;;  %vm1301_vm11 = vweird.f32 %v2464_v43  ;;  %vm1197_vm12 = vweird.f32 %v2460_v36  ;;  %s1722_s16 = scalar_lea.hbm %s2847_s6, %s1941_s9 }
 0x1ec   : > { %v1288_v53 = vor.u32 4788187, %v1287_v52  ;;  %v1291_v0 = vcvt.s32.f32 %v1284_v45  ;;  %v2219_v47 = vmov 2   ;;  %p2088_p7 = por %p2087_p6, %p2086_p5 }
 0x1ed   : > { %2060 = vset.pattern.permute.xlu1 %v2219_v47  ;;  %2061 = vset.pattern.permute.xlu0 %v2219_v47 }
 0x1ee   : > { %v1289_v48 = vand.u32 2147483647, %v1288_v53  ;;  %p2089_p9 = pnand %p2088_p7, %p2082_p4 }
 0x1f0   : > { %v1292_v41 = vmul.f32 %v1291_v0, %v1289_v48 }
 0x1f2   : > { %v2067_v2 = vpop.eup %2066  ;;  %v1293_v60 = vxor.u32 2147483648, %v1292_v41 }
 0x1f3   : > { %v2069_v58 = vpop.eup %2068  ;;  %v1517_v5 = vxor.u32 2147483648, %v2067_v2 }
 0x1f4   : > { %v1514_v24 = vxor.u32 2147483648, %v2069_v58  ;;  %v1294_v20 = vsel %vm1211_vm10, %v1293_v60, %v1292_v41  ;;  %v2071_v38 = vpop.eup %2070  ;;  %vm1304_vm10 = vcmp.lt.s32.totalorder %v1303_v29, 2 }
 0x1f5   : > { %v1518_v12 = vsel %vm1516_vm13, %v1517_v5, %v2069_v58  ;;  %v1297_v13 = vsel %vm2729_vm14, %v2464_v43, %v1294_v20  ;;  %v2073_v25 = vpop.eup %2072  ;;  %v1205_v28 = vxor.u32 2147483648, %v2071_v38  ;;  %vm1528_vm13 = vcmask 130048   ;;  %v2078_v43 = vld [vmem:[%s2846_s5] sm:$0xff] }
 0x1f6   : > { %v1515_v62 = vsel %vm1513_vm15, %v2067_v2, %v1514_v24  ;;  %2074 = vcosq.f32 %v1297_v13  ;;  %v1202_v27 = vxor.u32 2147483648, %v2073_v25  ;;  %1619 = vperm.xlu1 %2060, %v2078_v43  }
 0x1f7   : > { %v1519_v55 = vsel %vm1512_vm2, %v1515_v62, %v1518_v12  ;;  %2076 = vsinq.f32 %v1297_v13  ;;  %v1206_v33 = vsel %vm1204_vm6, %v1205_v28, %v2073_v25 }
 0x1f8   : > { %v1520_v1 = vsel %vm1509_vm3, nan, %v1519_v55  ;;  %v1203_v8 = vsel %vm1201_vm5, %v2071_v38, %v1202_v27 }
 0x1f9   : > { %1560 = vmatprep.subr.mxu1 %v1520_v1  ;;  %v1207_v35 = vsel %vm1200_vm9, %v1203_v8, %v1206_v33 }
 0x1fa   : > { %1561 = vmatpush1.msra.mxu1 %v1416_v22  ;;  %v1208_v61 = vsel %vm1197_vm12, nan, %v1207_v35 }
 0x203   : > { %v2075_v30 = vpop.eup %2074 }
 0x204   : > { %v2077_v6 = vpop.eup %2076  ;;  %v1309_v31 = vxor.u32 2147483648, %v2075_v30 }
 0x205   : > { %v1306_v3 = vxor.u32 2147483648, %v2077_v6 }
 0x206   : > { %v1310_v34 = vsel %vm1308_vm7, %v1309_v31, %v2077_v6 }
 0x207   : > { %v1307_v11 = vsel %vm1305_vm8, %v2075_v30, %v1306_v3 }
 0x208   : > { %v1311_v37 = vsel %vm1304_vm10, %v1307_v11, %v1310_v34 }
 0x209   : > { %v1312_v32 = vsel %vm1301_vm11, nan, %v1311_v37 }
 0x20a   : > { %1562 = vmatprep.subr.mxu1 %v1312_v32 }
 0x20b   : > { %1563 = vmatpush1.msra.mxu1 %v1208_v61 }
 0x20c   : > { %1935 = vmatmul.mubr.msk.f32.vlgmr.msra.gmra.mxu1 %vm1528_vm13, %v1521_v39 }
 0x20d   : > { %1689 = vmatprep.mubr.f32.mxu1 %v2204_v4 }
 0x24b   : > { %v1526_v36 = vpop.permute.xlu1 %1525 }
 0x24c   : > { %v1609_v4 = vpop.permute.xlu0 %1608 }
 0x2cc   : > { %v1598_v40 = vpop.f32.mrf.mxu1 }
 0x2cd   : > { %v1599_v18 = vadd.f32 %v1598_v40, %v1526_v36 }
 0x2ce   : > { %v1600_v57 = vpop.f32.mrf.mxu1 }
 0x2cf   : > { %v1601_v45 = vadd.f32 %v1600_v57, %v1526_v36  ;;  %v1605_v52 = vadd.f32 %v1603_v15, %v1599_v18 }
 0x2d1   : > { %1655 = vmatprep.subr.mxu1 %v1601_v45  ;;  %v1606_v26 = vadd.f32 %v1604_v42, %v1601_v45  ;;  %v1611_v53 = vmul.f32 %v1609_v4, %v1605_v52 }
 0x2d2   : > { %1656 = vmatpush1.msra.mxu1 %v1599_v18 }
 0x2d3   : > { %v1612_v56 = vmul.f32 %v1609_v4, %v1606_v26  ;;  %1613 = vst [vmem:[%s2352_s26] sm:$0xff] %v1611_v53  ;;  %1936 = vmatmul.mubr.msk.f32.vlgmr.msra.gmra.mxu1 %vm418_vm1, %v1615_v9 }
 0x2d5   : > { %1614 = vst [vmem:[%s2352_s26 + $0x8] sm:$0xff] %v1612_v56 }
 0x2d6   : > { %2092 = shalt.err (!%p2089_p9)
}
 0x2d7   : > { %s2093_s26 = scalar_lea.hbm %s1722_s16, 256  ;;  %s2097_s11 = scalar_lea.hbm %s2847_s6, 1024 }
 0x2d8   : > { %p2094_p10 = scmp.ne.s32.totalorder %s1722_s16, %s2093_s26  ;;  %p2098_p13 = scmp.lt.s32.totalorder %s1722_s16, %s2847_s6 }
 0x2d9   : > { %p2099_p0 = scmp.lt.s32.totalorder %s2097_s11, %s2093_s26 }
 0x2da   : > { %p2095_p11 = pnand %p2094_p10, %p2313_p3 }
 0x2db   : > { %p2100_p1 = por %p2099_p0, %p2098_p13 }
 0x2dc   : > { %p2096_p12 = pneg %p2095_p11 }
 0x2de   : > { %p2101_p2 = pnand %p2100_p1, %p2096_p12 }
 0x2e0   : > { %2104 = shalt.err (!%p2101_p2)
}
 0x2e1   : > { %1963 = dma.vmem_to_hbm [thread:$0]  (%p2313_p3), %s1725_s23, 256, %s1722_s16, %s1701_s17   ;;  %v1620_v59 = vpop.permute.xlu1 %1619 }
 0x2e2   : > { %s1742_s10 = sshll.u32 %s2354_s25, 4  ;;  %s1740_s29 = scalar_lea.hbm %s2848_s7, %s1941_s9  ;;  %s1743_s10 = int_to_ptr.vmem [resolvable:$true] %s1742_s10 }
 0x2e3   : > { %s1706_s28 = scalar_lea.sflag [#allocation6], %s2334_s20  ;;  %s2105_s21 = scalar_lea.vmem %s1743_s10, 256 }
 0x2e4   : > { %p2106_p4 = scmp.ne.s32.totalorder %s1743_s10, %s2105_s21  ;;  %s2221_s23 = smov [#allocation5]  }
 0x2e5   : > { %s2109_s16 = sshll.u32 %s2221_s23, 4  ;;  %s2110_s16 = int_to_ptr.vmem [resolvable:$false] %s2109_s16 }
 0x2e6   : > { %p2107_p5 = pnand %p2106_p4, %p2313_p3  ;;  %s2111_s17 = scalar_lea.vmem %s2110_s16, 512 }
 0x2e7   : > { %p2112_p7 = scmp.lt.s32.totalorder %s1743_s10, %s2110_s16  ;;  %p2113_p9 = scmp.lt.s32.totalorder %s2111_s17, %s2105_s21 }
 0x2e8   : > { %p2108_p6 = pneg %p2107_p5 }
 0x2e9   : > { %p2114_p10 = por %p2113_p9, %p2112_p7 }
 0x2eb   : > { %p2115_p11 = pnand %p2114_p10, %p2108_p6 }
 0x393   : > { %v1691_v63 = vpop.f32.mrf.mxu1 }
 0x394   : > { %v1692_v46 = vadd.f32 %v1691_v63, %v1620_v59 }
 0x395   : > { %v1693_v48 = vpop.f32.mrf.mxu1 }
 0x396   : > { %1696 = vst [vmem:[%s2354_s25] sm:$0xff] %v1692_v46  ;;  %v1694_v0 = vadd.f32 %v1693_v48, %v1620_v59 }
 0x398   : > { %1697 = vst [vmem:[%s2354_s25 + $0x8] sm:$0xff] %v1694_v0 }
 0x399   : > { %2118 = shalt.err (!%p2115_p11)
}
 0x39a   : > { %s2119_s19 = scalar_lea.hbm %s1740_s29, 256  ;;  %s2123_s9 = scalar_lea.hbm %s2848_s7, 1024 }
 0x39b   : > { %p2120_p12 = scmp.ne.s32.totalorder %s1740_s29, %s2119_s19  ;;  %p2124_p1 = scmp.lt.s32.totalorder %s1740_s29, %s2848_s7 }
 0x39c   : > { %p2125_p2 = scmp.lt.s32.totalorder %s2123_s9, %s2119_s19 }
 0x39d   : > { %p2121_p13 = pnand %p2120_p12, %p2313_p3 }
 0x39e   : > { %p2126_p4 = por %p2125_p2, %p2124_p1 }
 0x39f   : > { %p2122_p0 = pneg %p2121_p13 }
 0x3a1   : > { %p2127_p5 = pnand %p2126_p4, %p2122_p0 }
 0x3a3   : > { %2130 = shalt.err (!%p2127_p5)
}
 0x3a4   : > { %1964 = dma.vmem_to_hbm [thread:$0]  (%p2313_p3), %s1743_s10, 256, %s1740_s29, %s1706_s28  }
 0x3a5 PF: > { %p1974_p6 = scmp.ge.s32.totalorder %s2201_s8, 2  ;;  %s1754_s30 = sand.u32 1, %s2173_s24  }
 0x3a6   : > { %s1755_s11 = scalar_lea.sflag [#allocation4], %s1754_s30 }
 0x3a7   : > { %p1968_p7 = pnand %p1974_p6, %p2322_p8 }
 0x3a9   : > { %p1969_p9 = pneg %p1968_p7 }
 0x3ab   : > { %2164 = dma.done.wait (%p1969_p9), %s1755_s11, 256  }
 0x3ac   : > { %2166 = vsyncadd (%p1969_p9), %s1755_s11, 4294967040  ;;  %s1764_s12 = scalar_lea.sflag [#allocation6], %s1754_s30 }
 0x3ad   : > { %2168 = dma.done.wait (%p1969_p9), %s1764_s12, 256  }
 0x3ae   : > { %2170 = vsyncadd (%p1969_p9), %s1764_s12, 4294967040  ;;  %s24_s8 = sadd.s32 1, %s2201_s8   ;;  %s2872_s24 = sld [smem:[#allocation9_spill]] }
 0x3af   : > { %p21_p10 = scmp.ge.s32.totalorder %s24_s8, 6   ;;  %s2873_s25 = sld [smem:[#allocation10_spill]] }
 0x3b0   : > { %s2874_s26 = sld [smem:[#allocation15_spill]] }
 0x3b1   : > { %s2875_s27 = sld [smem:[#allocation11_spill]]  ;;  %23 = sbr.rel (!%p21_p10) target bundleno = 7 (0x7), region = 109 }
 0x3b2   : > { %s2876_s28 = sld [smem:[#allocation12_spill]] }
 0x3b3   : > { %s2877_s29 = sld [smem:[#allocation13_spill]] }
 0x3b4   : > { %s2878_s30 = sld [smem:[#allocation14_spill]] }
 0x3b6   :  { %1769 = vsyncpa [#allocation4], 1 }
 0x3b7   :  { %1771 = vsyncpa [#allocation4 + $0x1], 1 }
 0x3b8   :  { %1772 = vsyncpa [#allocation6], 1 }
 0x3b9   :  { %1774 = vsyncpa [#allocation6 + $0x1], 1 }

</bundles_post_ra>
